<compile_context>
chip_gen: v5e
topology: v5e:2x2
jax: 0.10.0
libtpu: 0.0.40
codegen_flags: <defaults>
</compile_context>

<pallas_src>
import jax
import jax.numpy as jnp
from jax import lax
from jax.experimental import pallas as pl
from jax.experimental.pallas import tpu as pltpu


def embednet_kernel(x_ref, wb_ref, bb_ref, convw_ref, convb_ref, cent_ref,
                    out_ref):
    """One grid step processes a block of BLK samples, batched where possible.

    x_ref    : (C_in, BLK*P)  raw pixels, channels leading, pixel axis lane-dense
    wb_ref   : (C_in, D)      base-model 1x1 conv weight (as a matmul)
    bb_ref   : (1, D)         base-model bias
    convw_ref: (K, D)         NetVLAD conv weight  (= 2*alpha*centroids)
    convb_ref: (K, 1)         NetVLAD conv bias    (= -alpha*||centroids||)
    cent_ref : (K, D)         NetVLAD centroids
    out_ref  : (BLK, K, D)    per-sample VLAD descriptor (pre-flatten)
    """
    eps = jnp.float32(1e-12)   # F.normalize default eps
    eps2 = eps * eps

    blk = out_ref.shape[0]
    m = x_ref.shape[1]         # blk * P pixels in this block
    p = m // blk

    wb = wb_ref[...]           # (C_in, D)
    bias = bb_ref[...]         # (1, D)
    convw = convw_ref[...]     # (K, D)
    convb = convb_ref[...]     # (K, 1)
    cent = cent_ref[...]       # (K, D)

    # ---- base model, batched over the whole block: 1x1 conv + ReLU ----
    # Contract C_in (transposed-LHS matmul) so feat lands as (M, D) with
    # M = blk*P rows: one MXU pipeline fill amortized across all samples.
    xb = x_ref[...]                                                   # (C_in, M)
    feat = lax.dot_general(xb, wb, (((0,), (0,)), ((), ())),
                           preferred_element_type=jnp.float32)        # (M, D)
    feat = jnp.maximum(feat + bias, 0.0)

    # ---- descriptor-wise L2 normalization over D (lane axis), batched ----
    ss = jnp.sum(feat * feat, axis=-1, keepdims=True)                 # (M, 1)
    xn = feat * lax.rsqrt(jnp.maximum(ss, eps2))                      # (M, D)

    # ---- soft assignment for the whole block in (K, M) layout ----
    # K=8 exactly fills the sublane group, M stays lane-dense, and the softmax
    # reduces over dense sublanes.  NOTE: this dot contracts xn's minor (lane)
    # dim (a trans-B matmul); it is computed once per grid step for the whole
    # block.  If lower_as_mlir shows a relayout at production P, switch the
    # feature tensor to a (D, M) layout instead (pre-transposing the tiny
    # convw alone cannot remove the trans-B here).
    logits = lax.dot_general(convw, xn, (((1,), (1,)), ((), ())),
                             preferred_element_type=jnp.float32)      # (K, M)
    logits = logits + convb                                           # (K, 1) bcast
    mx = jnp.max(logits, axis=0, keepdims=True)                       # (1, M)
    e = jnp.exp(logits - mx)                                          # (K, M)
    denom = jnp.sum(e, axis=0, keepdims=True)                         # (1, M)
    a = e * pl.reciprocal(denom, approx=True)                         # (K, M)

    # ---- per-sample VLAD aggregation + normalizations ----
    # blk is a small fixed constant (<= 16) so this static unroll is bounded;
    # each iteration's temporaries are only (K, D) = a few vregs and die at the
    # out_ref store.  Slices below are static and (8,128)-tile aligned.
    for b in range(blk):
        a_b = a[:, b * p:(b + 1) * p]                                 # (K, P)
        xn_b = xn[b * p:(b + 1) * p, :]                               # (P, D)

        # vlad[k, d] = sum_p a[k, p] * (xn[p, d] - cent[k, d])
        #            = (a @ xn)[k, d] - (sum_p a[k, p]) * cent[k, d]
        agg = jnp.dot(a_b, xn_b, preferred_element_type=jnp.float32)  # (K, D) f32
        asum = jnp.sum(a_b, axis=1, keepdims=True)                    # (K, 1)
        vlad = agg - asum * cent                                      # (K, D)

        # intra-normalization (per cluster, over D)
        sv = jnp.sum(vlad * vlad, axis=-1, keepdims=True)             # (K, 1)
        inv = lax.rsqrt(jnp.maximum(sv, eps2))                        # (K, 1)
        vlad = vlad * inv

        # global L2 normalization over the flattened (K*D) vector.
        # After the intra-norm, ||row_k||^2 == sv_k * inv_k^2 exactly, so the
        # global sum only needs a K-element reduce (no second K*D square).
        gs = jnp.sum(sv * (inv * inv))
        vlad = vlad * lax.rsqrt(jnp.maximum(gs, eps2))

        out_ref[b] = vlad.astype(out_ref.dtype)


def _tpu_budget():
    """Returns (per-core VMEM capacity bytes, multi-TensorCore chip?)."""
    vmem_cap = 64 << 20          # conservative fallback (v7x per-TC VMEM)
    try:
        info = pltpu.get_tpu_info()
        vmem_cap = int(info.vmem_capacity_bytes)
    except Exception:            # older jax / interpret runs: keep the fallback
        pass
    # v7x is the only generation with < 128 MiB per-TC VMEM and the only one
    # with 2 TensorCores per chip, so VMEM size doubles as the discriminator.
    multi_tc = vmem_cap < (128 << 20)
    return vmem_cap, multi_tc


def _block_footprint_bytes(blk, c_in, p, k, d):
    """Approximate per-grid-step VMEM footprint (f32, sublane-padded)."""
    f32 = 4
    c_pad = -(-c_in // 8) * 8
    k_pad = -(-k // 8) * 8
    m = blk * p
    x_blk = 2 * c_pad * m * f32                 # double-buffered input block
    out_blk = 2 * blk * k_pad * d * f32         # double-buffered output block
    weights = (c_pad * d + 8 * d + 2 * k_pad * d + k_pad * 128) * f32
    feat_xn = 2 * m * d * f32                   # feat + xn f32 temporaries
    assign = 2 * k_pad * m * f32                # logits + softmax weights
    return x_blk + out_blk + weights + feat_xn + assign


def _choose_block(n, c_in, p, k, d, vmem_budget, multi_tc):
    """Small fixed block size: bounded unroll, fits VMEM, enough grid steps."""
    cap = 16                                    # review: blk ~ 4-16, never N//2
    if multi_tc and n >= 2:
        # v7x: aim for >= min(N, 4) parallel grid steps (>= 2 per TensorCore).
        cap = min(cap, max(1, n // min(n, 4)))
    cap = max(1, min(cap, n))

    best = 1
    for blk in range(1, cap + 1):
        if n % blk:
            continue
        if blk != n and (blk * p) % 128:
            continue                             # (8,128) lane constraint on x block
        if _block_footprint_bytes(blk, c_in, p, k, d) > vmem_budget:
            continue
        best = blk
    if best != n and (best * p) % 128:
        best = n                                 # fall back to one full-array block
    return best


def embednet_forward(x_nchw, wb, bb, conv_w, conv_b, centroids):
    """x_nchw: (N, C_in, H, W) float32. Returns (N, K*D) float32."""
    n, c_in, h, w = x_nchw.shape
    p = h * w
    k, d = centroids.shape

    vmem_cap, multi_tc = _tpu_budget()
    # Leave headroom below the physical per-core capacity for the working set.
    vmem_budget = (vmem_cap * 3) // 4
    blk = _choose_block(n, c_in, p, k, d, vmem_budget, multi_tc)

    # NCHW -> (C_in, N*P): cheap HBM transpose of a C_in-channel tensor.  The
    # pixel axis is lane-dense, so each grid step DMAs one contiguous slab and
    # the base-conv matmul runs with M = blk*P rows.
    x = jnp.transpose(x_nchw.reshape(n, c_in, p), (1, 0, 2)).reshape(c_in, n * p)

    bb2 = bb.reshape(1, d)
    cb2 = conv_b.reshape(k, 1)     # (K, 1) so it broadcasts over the pixel lane axis

    grid = (n // blk,)

    footprint = _block_footprint_bytes(blk, c_in, p, k, d)
    vmem_limit = int(min(vmem_budget, max(2 * footprint + (4 << 20), 16 << 20)))

    out = pl.pallas_call(
        embednet_kernel,
        out_shape=jax.ShapeDtypeStruct((n, k, d), jnp.float32),
        grid_spec=pltpu.PrefetchScalarGridSpec(
            num_scalar_prefetch=0,
            grid=grid,
            in_specs=[
                pl.BlockSpec((c_in, blk * p), lambda i: (0, i)),
                pl.BlockSpec((c_in, d), lambda i: (0, 0)),
                pl.BlockSpec((1, d), lambda i: (0, 0)),
                pl.BlockSpec((k, d), lambda i: (0, 0)),
                pl.BlockSpec((k, 1), lambda i: (0, 0)),
                pl.BlockSpec((k, d), lambda i: (0, 0)),
            ],
            out_specs=pl.BlockSpec((blk, k, d), lambda i: (i, 0, 0)),
        ),
        compiler_params=pltpu.CompilerParams(
            dimension_semantics=("parallel",),
            vmem_limit_bytes=vmem_limit),
    )(x, wb, bb2, conv_w, cb2, centroids)

    # (N, K, D) -> (N, K*D): free, layout-preserving reshape (row-major).
    return out.reshape(n, k * d)


def embednet_reference(x_nchw, wb, bb, conv_w, conv_b, centroids):
    """Pure-JAX reference mirroring the PyTorch forward, for validation."""
    eps = 1e-12
    n, c_in, h, w = x_nchw.shape
    p = h * w
    k, d = centroids.shape
    x = jnp.transpose(x_nchw.reshape(n, c_in, p), (0, 2, 1))  # (N, P, C_in)
    feat = jnp.maximum(jnp.einsum("npc,cd->npd", x, wb) + bb[None, None, :], 0.0)
    xn = feat / jnp.maximum(
        jnp.linalg.norm(feat, axis=-1, keepdims=True), eps)
    logits = jnp.einsum("npd,kd->npk", xn, conv_w) + conv_b[None, None, :]
    a = jax.nn.softmax(logits, axis=-1)  # (N, P, K)
    vlad = jnp.einsum("npk,npd->nkd", a, xn) - \
        jnp.sum(a, axis=1)[:, :, None] * centroids[None, :, :]
    vlad = vlad / jnp.maximum(
        jnp.linalg.norm(vlad, axis=-1, keepdims=True), eps)
    vlad = vlad.reshape(n, k * d)
    vlad = vlad / jnp.maximum(
        jnp.linalg.norm(vlad, axis=-1, keepdims=True), eps)
    return vlad


if __name__ == "__main__":
    # Small shapes consistent with the module's forward.
    N, C_IN, H, W = 2, 4, 16, 16     # image input (NCHW)
    DIM = 128                        # NetVLAD descriptor dim
    K = 8                            # num_clusters
    ALPHA = 100.0

    key = jax.random.PRNGKey(0)
    k_x, k_wb, k_bb, k_cent = jax.random.split(key, 4)

    x = jax.random.normal(k_x, (N, C_IN, H, W), dtype=jnp.float32)

    # Synthetic base model params: 1x1 conv C_IN -> DIM (+ ReLU).
    wb = jax.random.normal(k_wb, (C_IN, DIM), dtype=jnp.float32) * 0.1
    bb = jax.random.normal(k_bb, (DIM,), dtype=jnp.float32) * 0.1

    # NetVLAD params, initialized exactly as NetVLAD._init_params:
    #   centroids ~ U[0,1);  conv.weight = 2*alpha*centroids;
    #   conv.bias = -alpha*||centroids||
    centroids = jax.random.uniform(k_cent, (K, DIM), dtype=jnp.float32)
    conv_w = 2.0 * ALPHA * centroids
    conv_b = -ALPHA * jnp.linalg.norm(centroids, axis=1)

    run = jax.jit(embednet_forward)
    out = run(x, wb, bb, conv_w, conv_b, centroids)
    out = jax.block_until_ready(out)

    ref = embednet_reference(x, wb, bb, conv_w, conv_b, centroids)
    assert out.shape == (N, K * DIM)
    assert jnp.allclose(out, ref, atol=1e-2, rtol=1e-2), "mismatch vs reference"

    print("KERNEL_OK")
</pallas_src>

<mosaic_0001>
module attributes {stable_mosaic.version = 11 : i64} {
  func.func @embednet_kernel(%arg0: i32, %arg1: memref<4x256xf32, #tpu.memory_space<vmem>>, %arg2: memref<4x128xf32, #tpu.memory_space<vmem>>, %arg3: memref<1x128xf32, #tpu.memory_space<vmem>>, %arg4: memref<8x128xf32, #tpu.memory_space<vmem>>, %arg5: memref<8x1xf32, #tpu.memory_space<vmem>>, %arg6: memref<8x128xf32, #tpu.memory_space<vmem>>, %arg7: memref<1x8x128xf32, #tpu.memory_space<vmem>>) attributes {dimension_semantics = [#tpu.dimension_semantics<parallel>], iteration_bounds = array<i64: 2>, scalar_prefetch = 0 : i64, scratch_operands = 0 : i64, tpu.core_type = #tpu.core_type<tc>, window_params = [{transform_indices = @transform_0, window_bounds = array<i64: 4, 256>}, {pipeline_mode = #tpu.pipeline_mode<synchronous>, transform_indices = @transform_1, window_bounds = array<i64: 4, 128>}, {pipeline_mode = #tpu.pipeline_mode<synchronous>, transform_indices = @transform_2, window_bounds = array<i64: 1, 128>}, {pipeline_mode = #tpu.pipeline_mode<synchronous>, transform_indices = @transform_3, window_bounds = array<i64: 8, 128>}, {pipeline_mode = #tpu.pipeline_mode<synchronous>, transform_indices = @transform_4, window_bounds = array<i64: 8, 1>}, {pipeline_mode = #tpu.pipeline_mode<synchronous>, transform_indices = @transform_5, window_bounds = array<i64: 8, 128>}, {transform_indices = @transform_6, window_bounds = array<i64: 1, 8, 128>}]} {
    %cst = arith.constant 9.99999996E-13 : f32
    %cst_0 = arith.constant 9.99999996E-13 : f32
    %0 = arith.mulf %cst, %cst_0 : f32
    %c0 = arith.constant 0 : index
    %c0_1 = arith.constant 0 : index
    %1 = vector.load %arg2[%c0, %c0_1] : memref<4x128xf32, #tpu.memory_space<vmem>>, vector<4x128xf32>
    %c0_2 = arith.constant 0 : index
    %c0_3 = arith.constant 0 : index
    %2 = vector.load %arg3[%c0_2, %c0_3] : memref<1x128xf32, #tpu.memory_space<vmem>>, vector<1x128xf32>
    %c0_4 = arith.constant 0 : index
    %c0_5 = arith.constant 0 : index
    %3 = vector.load %arg4[%c0_4, %c0_5] : memref<8x128xf32, #tpu.memory_space<vmem>>, vector<8x128xf32>
    %c0_6 = arith.constant 0 : index
    %c0_7 = arith.constant 0 : index
    %4 = vector.load %arg5[%c0_6, %c0_7] : memref<8x1xf32, #tpu.memory_space<vmem>>, vector<8x1xf32>
    %c0_8 = arith.constant 0 : index
    %c0_9 = arith.constant 0 : index
    %5 = vector.load %arg6[%c0_8, %c0_9] : memref<8x128xf32, #tpu.memory_space<vmem>>, vector<8x128xf32>
    %c0_10 = arith.constant 0 : index
    %c0_11 = arith.constant 0 : index
    %6 = vector.load %arg1[%c0_10, %c0_11] : memref<4x256xf32, #tpu.memory_space<vmem>>, vector<4x256xf32>
    %cst_12 = arith.constant dense<0.000000e+00> : vector<256x128xf32>
    %7 = tpu.matmul %6, %1, %cst_12 {dimension_numbers = #tpu.dot_dimension_numbers<[0], [0], [1], [1], [0, 1, 1, 1], [], []>} : vector<4x256xf32>, vector<4x128xf32>, vector<256x128xf32> -> vector<256x128xf32>
    %8 = vector.broadcast %2 : vector<1x128xf32> to vector<256x128xf32>
    %9 = arith.addf %7, %8 : vector<256x128xf32>
    %cst_13 = arith.constant 0.000000e+00 : f32
    %10 = vector.broadcast %cst_13 : f32 to vector<256x128xf32>
    %11 = arith.maximumf %9, %10 : vector<256x128xf32>
    %12 = arith.mulf %11, %11 : vector<256x128xf32>
    %cst_14 = arith.constant dense<0.000000e+00> : vector<256xf32>
    %13 = vector.multi_reduction <add>, %12, %cst_14 [1] : vector<256x128xf32> to vector<256xf32>
    %14 = vector.shape_cast %13 : vector<256xf32> to vector<256x1xf32>
    %15 = vector.broadcast %0 : f32 to vector<256x1xf32>
    %16 = arith.maximumf %14, %15 : vector<256x1xf32>
    %17 = math.rsqrt %16 : vector<256x1xf32>
    %18 = vector.broadcast %17 : vector<256x1xf32> to vector<256x128xf32>
    %19 = arith.mulf %11, %18 : vector<256x128xf32>
    %cst_15 = arith.constant dense<0.000000e+00> : vector<8x256xf32>
    %20 = tpu.matmul %3, %19, %cst_15 {dimension_numbers = #tpu.dot_dimension_numbers<[1], [1], [0], [0], [0, 0, 1, 0], [], []>} : vector<8x128xf32>, vector<256x128xf32>, vector<8x256xf32> -> vector<8x256xf32>
    %21 = vector.broadcast %4 : vector<8x1xf32> to vector<8x256xf32>
    %22 = arith.addf %20, %21 : vector<8x256xf32>
    %cst_16 = arith.constant dense<0xFF800000> : vector<256xf32>
    %23 = vector.multi_reduction <maximumf>, %22, %cst_16 [0] : vector<8x256xf32> to vector<256xf32>
    %24 = vector.shape_cast %23 : vector<256xf32> to vector<1x256xf32>
    %25 = vector.broadcast %24 : vector<1x256xf32> to vector<8x256xf32>
    %26 = arith.subf %22, %25 : vector<8x256xf32>
    %27 = math.exp %26 : vector<8x256xf32>
    %cst_17 = arith.constant dense<0.000000e+00> : vector<256xf32>
    %28 = vector.multi_reduction <add>, %27, %cst_17 [0] : vector<8x256xf32> to vector<256xf32>
    %29 = vector.shape_cast %28 : vector<256xf32> to vector<1x256xf32>
    %30 = tpu.reciprocal %29 {approx = true} : vector<1x256xf32> -> vector<1x256xf32>
    %31 = vector.broadcast %30 : vector<1x256xf32> to vector<8x256xf32>
    %32 = arith.mulf %27, %31 : vector<8x256xf32>
    %cst_18 = arith.constant dense<0.000000e+00> : vector<8x128xf32>
    %33 = tpu.matmul %32, %19, %cst_18 {dimension_numbers = #tpu.dot_dimension_numbers<[1], [0], [0], [1], [0, 0, 1, 1], [], []>} : vector<8x256xf32>, vector<256x128xf32>, vector<8x128xf32> -> vector<8x128xf32>
    %cst_19 = arith.constant dense<0.000000e+00> : vector<8xf32>
    %34 = vector.multi_reduction <add>, %32, %cst_19 [1] : vector<8x256xf32> to vector<8xf32>
    %35 = vector.shape_cast %34 : vector<8xf32> to vector<8x1xf32>
    %36 = vector.broadcast %35 : vector<8x1xf32> to vector<8x128xf32>
    %37 = arith.mulf %36, %5 : vector<8x128xf32>
    %38 = arith.subf %33, %37 : vector<8x128xf32>
    %39 = arith.mulf %38, %38 : vector<8x128xf32>
    %cst_20 = arith.constant dense<0.000000e+00> : vector<8xf32>
    %40 = vector.multi_reduction <add>, %39, %cst_20 [1] : vector<8x128xf32> to vector<8xf32>
    %41 = vector.shape_cast %40 : vector<8xf32> to vector<8x1xf32>
    %42 = vector.broadcast %0 : f32 to vector<8x1xf32>
    %43 = arith.maximumf %41, %42 : vector<8x1xf32>
    %44 = math.rsqrt %43 : vector<8x1xf32>
    %45 = vector.broadcast %44 : vector<8x1xf32> to vector<8x128xf32>
    %46 = arith.mulf %38, %45 : vector<8x128xf32>
    %47 = arith.mulf %44, %44 : vector<8x1xf32>
    %48 = arith.mulf %41, %47 : vector<8x1xf32>
    %49 = vector.shape_cast %48 : vector<8x1xf32> to vector<1x8x1xf32>
    %cst_21 = arith.constant dense<0.000000e+00> : vector<1xf32>
    %50 = vector.multi_reduction <add>, %49, %cst_21 [1, 2] : vector<1x8x1xf32> to vector<1xf32>
    %51 = vector.shape_cast %50 : vector<1xf32> to vector<1x1x1xf32>
    %52 = vector.extract %51[0, 0, 0] : f32 from vector<1x1x1xf32>
    %53 = arith.maximumf %52, %0 : f32
    %54 = math.rsqrt %53 : f32
    %55 = vector.broadcast %54 : f32 to vector<8x128xf32>
    %56 = arith.mulf %46, %55 : vector<8x128xf32>
    %c0_22 = arith.constant 0 : index
    %c0_23 = arith.constant 0 : index
    %c0_24 = arith.constant 0 : index
    %57 = vector.load %arg7[%c0_22, %c0_23, %c0_24] : memref<1x8x128xf32, #tpu.memory_space<vmem>>, vector<1x8x128xf32>
    %58 = vector.shape_cast %57 : vector<1x8x128xf32> to vector<8x128xf32>
    %59 = vector.shape_cast %56 : vector<8x128xf32> to vector<1x8x128xf32>
    tpu.vector_store %arg7[%c0_22, %c0_23, %c0_24], %59 {strides = array<i32>} : memref<1x8x128xf32, #tpu.memory_space<vmem>>, vector<1x8x128xf32>,
    return
  }
  func.func @transform_0(%arg0: i32) -> (i32, i32) {
    %c0_i32 = arith.constant 0 : i32
    %c0_i32_0 = arith.constant 0 : i32
    return %c0_i32, %arg0 : i32, i32
  }
  func.func @transform_1(%arg0: i32) -> (i32, i32) {
    %c0_i32 = arith.constant 0 : i32
    %c0_i32_0 = arith.constant 0 : i32
    %c0_i32_1 = arith.constant 0 : i32
    return %c0_i32, %c0_i32_0 : i32, i32
  }
  func.func @transform_2(%arg0: i32) -> (i32, i32) {
    %c0_i32 = arith.constant 0 : i32
    %c0_i32_0 = arith.constant 0 : i32
    %c0_i32_1 = arith.constant 0 : i32
    return %c0_i32, %c0_i32_0 : i32, i32
  }
  func.func @transform_3(%arg0: i32) -> (i32, i32) {
    %c0_i32 = arith.constant 0 : i32
    %c0_i32_0 = arith.constant 0 : i32
    %c0_i32_1 = arith.constant 0 : i32
    return %c0_i32, %c0_i32_0 : i32, i32
  }
  func.func @transform_4(%arg0: i32) -> (i32, i32) {
    %c0_i32 = arith.constant 0 : i32
    %c0_i32_0 = arith.constant 0 : i32
    %c0_i32_1 = arith.constant 0 : i32
    return %c0_i32, %c0_i32_0 : i32, i32
  }
  func.func @transform_5(%arg0: i32) -> (i32, i32) {
    %c0_i32 = arith.constant 0 : i32
    %c0_i32_0 = arith.constant 0 : i32
    %c0_i32_1 = arith.constant 0 : i32
    return %c0_i32, %c0_i32_0 : i32, i32
  }
  func.func @transform_6(%arg0: i32) -> (i32, i32, i32) {
    %c0_i32 = arith.constant 0 : i32
    %c0_i32_0 = arith.constant 0 : i32
    %c0_i32_1 = arith.constant 0 : i32
    return %arg0, %c0_i32, %c0_i32_0 : i32, i32, i32
  }
}

</mosaic_0001>

<bundles_post_ra>
// kernel: embednet_forward.1
= control target key start
LH: loop header
LB: loop body
LE: loop exit
PB: predicated region body
PF: predicated region fallthrough
CT: control target
= control target key end

     0   :  { %s1462_s21 = smov 0   ;;  %s2351_s0 = inlined_call_operand.vmem [shape: f32[4,512], index: 0, kind: input, shape index: {}]   ;;  %s2352_s1 = inlined_call_operand.vmem [shape: f32[4,128], index: 1, kind: input, shape index: {}]   ;;  %s2353_s2 = inlined_call_operand.vmem [shape: f32[1,128], index: 2, kind: input, shape index: {}]   ;;  %s2354_s3 = inlined_call_operand.vmem [shape: f32[8,128], index: 3, kind: input, shape index: {}]   ;;  %s2355_s4 = inlined_call_operand.vmem [shape: f32[8,1], index: 4, kind: input, shape index: {}]   ;;  %s2356_s5 = inlined_call_operand.vmem [shape: f32[8,128], index: 5, kind: input, shape index: {}]   ;;  %s2357_s6 = inlined_call_operand.vmem [shape: f32[2,8,128], index: 6, kind: output, shape index: {}]  }
   0x1 LB: > { %s1468_s22 = sadd.s32 4294967295, %s1423_s21   ;;  %p1282_p0 = scmp.ge.s32.totalorder %s1423_s21, 1  ;;  %s1423_s21 = sphi %s1462_s21, %s16_s21  }
   0x2   : > { %p213_p1 = scmp.lt.s32.totalorder %s1423_s21, 3 }
   0x4   : > { %p214_p2 = pnand %p1282_p0, %p213_p1 }
   0x6   : > { %217 = sbr.rel (%p214_p2) target bundleno = 1501 (0x5dd), region = 44 }
   0xb   : > { %s1283_s23 = sshll.u32 %s1468_s22, 1  ;;  %v252_v6 = vld [vmem:[%s2352_s1] sm:$0xf]  ;;  %vm428_vm0 = vcmask 1043456   ;;  %vm331_vm1 = vcmask 31744   ;;  %p248_p4 = scmp.lt.s32.totalorder %s1468_s22, 1 }
   0xc   : > { %p243_p3 = scmp.lt.s32.totalorder %s1283_s23, 3  ;;  %1322 = vmatpush.msk.msra.mxu2 %vm428_vm0, %v252_v6  ;;  %1286 = vmatpush.msk.msra.mxu0 %vm428_vm0, %v252_v6  ;;  %v1516_v30 = vld [vmem:[%s2353_s2] ss:$0 sm:$0xff]  ;;  %s1426_s15 = smov 1e-24  }
   0xd   : > { %1321 = vmatpush.msk.msra.mxu1 %vm428_vm0, %v252_v6  ;;  %s2484_s22 = smov (!%p248_p4, %s1468_s22), 1 }
   0xe   : > { %s2482_s23 = smov (!%p243_p3, %s1283_s23), 3  ;;  %s1285_s17 = sshll.u32 %s2484_s22, 3 }
   0xf   : > { %s1284_s24 = sshll.u32 %s2482_s23, 2  ;;  %s251_s23 = scalar_lea.vmem %s2357_s6, %s1285_s17 }
  0x10   : > { %s246_s27 = scalar_lea.vmem %s2351_s0, %s1284_s24 }
  0x11   : > { %v257_v0 = vld [vmem:[%s246_s27] sm:$0xff] }
  0x12   : > { %262 = vst [vmem:[#allocation1] ss:$2 sm:$0xff] %v257_v0 }
  0x19   : > { %v264_v1 = vld.sshfl [vmem:[#allocation1 + $0x8] sm:$0xff pattern:$0x75316420]  ;;  %v263_v2 = vld.sshfl [vmem:[#allocation1] sm:$0xff pattern:$0x75316420] }
  0x1a   : > { %299 = vxpose.xlu0.b32.start.end [1/1] (short) %v264_v1, 128 }
  0x9a   : > { %267 = vxpose.xlu0.b32.start.end [1/1] (short) %v263_v2, 128 }
  0xbe   : > { %v1476_v3 = vpop.trf.xlu0 }
  0xc6   : > { %v1478_v4 = vpop.trf.xlu0 }
  0xce   : > { %v1480_v5 = vpop.trf.xlu0 }
  0xd6   : > { %v1485_v7 = vpop.trf.xlu0 }
  0xde   : > { %v1487_v8 = vpop.trf.xlu0 }
  0xe6   : > { %v1489_v9 = vpop.trf.xlu0 }
  0xee   : > { %v1491_v10 = vpop.trf.xlu0 }
  0xf6   : > { %v322_v11 = vpop.trf.xlu0 }
  0xf7   : > { %1310 = vmatmul.msk.f32.vlgmr.msra.gmra.mxu2 %vm331_vm1, %v322_v11 }
  0xfe   : > { %v323_v12 = vpop.trf.xlu0 }
  0xff   : > { %1311 = vmatmul.msk.f32.gmra.mxu2 %vm331_vm1, %v323_v12 }
 0x106   : > { %v324_v13 = vpop.trf.xlu0 }
 0x107   : > { %1312 = vmatmul.msk.f32.gmra.mxu2 %vm331_vm1, %v324_v13 }
 0x10e   : > { %v325_v14 = vpop.trf.xlu0 }
 0x10f   : > { %1313 = vmatmul.msk.f32.gmra.mxu2 %vm331_vm1, %v325_v14 }
 0x116   : > { %v326_v15 = vpop.trf.xlu0 }
 0x117   : > { %1314 = vmatmul.msk.f32.gmra.mxu2 %vm331_vm1, %v326_v15 }
 0x11e   : > { %v327_v16 = vpop.trf.xlu0 }
 0x11f   : > { %1315 = vmatmul.msk.f32.gmra.mxu2 %vm331_vm1, %v327_v16 }
 0x126   : > { %v328_v17 = vpop.trf.xlu0 }
 0x127   : > { %1316 = vmatmul.msk.f32.gmra.mxu2 %vm331_vm1, %v328_v17 }
 0x12e   : > { %v329_v18 = vpop.trf.xlu0 }
 0x12f   : > { %1317 = vmatmul.msk.f32.gmra.mxu2 %vm331_vm1, %v329_v18 }
 0x136   : > { %v330_v19 = vpop.trf.xlu0 }
 0x137   : > { %1318 = vmatmul.msk.f32.gmra.mxu2 %vm331_vm1, %v330_v19 }
 0x13e   : > { %v283_v20 = vpop.trf.xlu0 }
 0x13f   : > { %1287 = vmatmul.msk.f32.vlgmr.msra.gmra.mxu0 %vm331_vm1, %v283_v20 }
 0x146   : > { %v284_v21 = vpop.trf.xlu0 }
 0x147   : > { %1288 = vmatmul.msk.f32.gmra.mxu0 %vm331_vm1, %v284_v21 }
 0x14e   : > { %v285_v22 = vpop.trf.xlu0 }
 0x14f   : > { %1289 = vmatmul.msk.f32.gmra.mxu0 %vm331_vm1, %v285_v22 }
 0x156   : > { %v286_v23 = vpop.trf.xlu0 }
 0x157   : > { %1290 = vmatmul.msk.f32.gmra.mxu0 %vm331_vm1, %v286_v23 }
 0x15e   : > { %v287_v24 = vpop.trf.xlu0 }
 0x15f   : > { %1291 = vmatmul.msk.f32.gmra.mxu0 %vm331_vm1, %v287_v24 }
 0x166   : > { %v288_v25 = vpop.trf.xlu0 }
 0x167   : > { %1292 = vmatmul.msk.f32.gmra.mxu0 %vm331_vm1, %v288_v25 }
 0x16e   : > { %v289_v26 = vpop.trf.xlu0 }
 0x16f   : > { %1293 = vmatmul.msk.f32.gmra.mxu0 %vm331_vm1, %v289_v26 }
 0x176   : > { %v290_v27 = vpop.trf.xlu0 }
 0x177   : > { %1294 = vmatmul.msk.f32.gmra.mxu0 %vm331_vm1, %v290_v27 }
 0x17a   : > { %v1510_v28 = vpop.f32.mrf.mxu2 }
 0x17e   : > { %v291_v29 = vpop.trf.xlu0 }
 0x17f   : > { %1295 = vmatmul.msk.f32.gmra.mxu0 %vm331_vm1, %v291_v29 }
 0x182   : > { %v521_v31 = vpop.f32.mrf.mxu2 }
 0x183   : > { %v522_v32 = vadd.f32 %v1516_v30, %v521_v31 }
 0x185   : > { %v1519_v33 = vmax.f32 %v522_v32, 0.0 }
 0x186   : > { %v292_v34 = vpop.trf.xlu0 }
 0x187   : > { %2390 = vst [vmem:[#allocation2_spill] sm:$0xff] %v1519_v33  ;;  %1296 = vmatmul.msk.f32.gmra.mxu0 %vm331_vm1, %v292_v34  ;;  %v601_v35 = vmul.f32 %v1519_v33, %v1519_v33 }
 0x189   : > { %657 = vadd.xlane.f32.xlu2 %v601_v35 }
 0x18a   : > { %v524_v36 = vpop.f32.mrf.mxu2 }
 0x18b   : > { %v525_v37 = vadd.f32 %v1516_v30, %v524_v36 }
 0x18d   : > { %v1525_v38 = vmax.f32 %v525_v37, 0.0 }
 0x18e   : > { %v293_v39 = vpop.trf.xlu0 }
 0x18f   : > { %2391 = vst [vmem:[#allocation3_spill] sm:$0xff] %v1525_v38  ;;  %1297 = vmatmul.msk.f32.gmra.mxu0 %vm331_vm1, %v293_v39  ;;  %v602_v40 = vmul.f32 %v1525_v38, %v1525_v38 }
 0x191   : > { %659 = vadd.xlane.f32.xlu2 %v602_v40 }
 0x192   : > { %v527_v41 = vpop.f32.mrf.mxu2 }
 0x193   : > { %v528_v42 = vadd.f32 %v1516_v30, %v527_v41 }
 0x195   : > { %v1531_v43 = vmax.f32 %v528_v42, 0.0 }
 0x196   : > { %v294_v44 = vpop.trf.xlu0 }
 0x197   : > { %2392 = vst [vmem:[#allocation4_spill] sm:$0xff] %v1531_v43  ;;  %1298 = vmatmul.msk.f32.gmra.mxu0 %vm331_vm1, %v294_v44  ;;  %v603_v45 = vmul.f32 %v1531_v43, %v1531_v43 }
 0x199   : > { %661 = vadd.xlane.f32.xlu2 %v603_v45 }
 0x19a   : > { %v530_v46 = vpop.f32.mrf.mxu2 }
 0x19b   : > { %v531_v47 = vadd.f32 %v1516_v30, %v530_v46  ;;  %v519_v46 = vadd.f32 %v1516_v30, %v1510_v28 }
 0x19d   : > { %v1537_v48 = vmax.f32 %v531_v47, 0.0 }
 0x19e   : > { %v295_v49 = vpop.trf.xlu0 }
 0x19f   : > { %2393 = vst [vmem:[#allocation5_spill] sm:$0xff] %v1537_v48  ;;  %1299 = vmatmul.msk.f32.gmra.mxu0 %vm331_vm1, %v295_v49  ;;  %v604_v50 = vmul.f32 %v1537_v48, %v1537_v48 }
 0x1a1   : > { %663 = vadd.xlane.f32.xlu2 %v604_v50 }
 0x1a2   : > { %v533_v51 = vpop.f32.mrf.mxu2 }
 0x1a3   : > { %v534_v52 = vadd.f32 %v1516_v30, %v533_v51 }
 0x1a5   : > { %v1543_v53 = vmax.f32 %v534_v52, 0.0  ;;  %v1631_v52 = vmax.f32 %v519_v46, 0.0 }
 0x1a6   : > { %v296_v54 = vpop.trf.xlu0 }
 0x1a7   : > { %2394 = vst [vmem:[#allocation6_spill] sm:$0xff] %v1543_v53  ;;  %1300 = vmatmul.msk.f32.vlgmr.msra.gmra.mxu1 %vm331_vm1, %v296_v54  ;;  %v605_v55 = vmul.f32 %v1543_v53, %v1543_v53  ;;  %v600_v28 = vmul.f32 %v1631_v52, %v1631_v52 }
 0x1a8   : > { %2396 = vst [vmem:[#allocation8_spill] sm:$0xff] %v1631_v52 }
 0x1a9   : > { %665 = vadd.xlane.f32.xlu2 %v605_v55 }
 0x1aa   : > { %v536_v56 = vpop.f32.mrf.mxu2 }
 0x1ab   : > { %v537_v57 = vadd.f32 %v1516_v30, %v536_v56 }
 0x1ad   : > { %v1549_v58 = vmax.f32 %v537_v57, 0.0 }
 0x1ae   : > { %v297_v59 = vpop.trf.xlu0 }
 0x1af   : > { %2395 = vst [vmem:[#allocation7_spill] sm:$0xff] %v1549_v58  ;;  %1301 = vmatmul.msk.f32.gmra.mxu1 %vm331_vm1, %v297_v59  ;;  %v606_v60 = vmul.f32 %v1549_v58, %v1549_v58 }
 0x1b1   : > { %667 = vadd.xlane.f32.xlu2 %v606_v60 }
 0x1b2   : > { %v539_v32 = vpop.f32.mrf.mxu2 }
 0x1b3   : > { %v540_v37 = vadd.f32 %v1516_v30, %v539_v32 }
 0x1b5   : > { %v1617_v41 = vmax.f32 %v540_v37, 0.0 }
 0x1b6   : > { %v298_v61 = vpop.trf.xlu0 }
 0x1b7   : > { %1302 = vmatmul.msk.f32.gmra.mxu1 %vm331_vm1, %v298_v61  ;;  %v607_v49 = vmul.f32 %v1617_v41, %v1617_v41 }
 0x1ba   : > { %v542_v44 = vpop.f32.mrf.mxu2 }
 0x1bb   : > { %v543_v47 = vadd.f32 %v1516_v30, %v542_v44 }
 0x1bc   : > { %v1555_v62 = vpop.f32.mrf.mxu0 }
 0x1bd   : > { %v1633_v54 = vmax.f32 %v543_v47, 0.0 }
 0x1bf   : > { %1303 = vmatmul.msk.f32.gmra.mxu1 %vm331_vm1, %v1476_v3  ;;  %v608_v56 = vmul.f32 %v1633_v54, %v1633_v54 }
 0x1c4   : > { %v1559_v63 = vpop.f32.mrf.mxu0 }
 0x1c5   : > { %v453_v44 = vadd.f32 %v1516_v30, %v1559_v63 }
 0x1c7   : > { %1304 = vmatmul.msk.f32.gmra.mxu1 %vm331_vm1, %v1478_v4 }
 0x1cc   : > { %v1563_v0 = vpop.f32.mrf.mxu0 }
 0x1cd   : > { %v456_v32 = vadd.f32 %v1516_v30, %v1563_v0 }
 0x1cf   : > { %1305 = vmatmul.msk.f32.gmra.mxu1 %vm331_vm1, %v1480_v5 }
 0x1d4   : > { %v1567_v1 = vpop.f32.mrf.mxu0 }
 0x1d7   : > { %1306 = vmatmul.msk.f32.gmra.mxu1 %vm331_vm1, %v1485_v7 }
 0x1dc   : > { %v1571_v2 = vpop.f32.mrf.mxu0 }
 0x1df   : > { %1307 = vmatmul.msk.f32.gmra.mxu1 %vm331_vm1, %v1487_v8 }
 0x1e4   : > { %v1575_v3 = vpop.f32.mrf.mxu0 }
 0x1e7   : > { %1308 = vmatmul.msk.f32.gmra.mxu1 %vm331_vm1, %v1489_v9 }
 0x1ec   : > { %v467_v4 = vpop.f32.mrf.mxu0 }
 0x1ed   : > { %v468_v60 = vadd.f32 %v1516_v30, %v467_v4 }
 0x1ef   : > { %1309 = vmatmul.msk.f32.gmra.mxu1 %vm331_vm1, %v1491_v10 }
 0x1f4   : > { %v470_v5 = vpop.f32.mrf.mxu0 }
 0x1f5   : > { %v471_v55 = vadd.f32 %v1516_v30, %v470_v5  ;;  %v465_v5 = vadd.f32 %v1516_v30, %v1575_v3 }
 0x1f7   : > { %v1640_v59 = vmax.f32 %v471_v55, 0.0 }
 0x1f9   : > { %v584_v61 = vmul.f32 %v1640_v59, %v1640_v59 }
 0x1fc   : > { %v473_v6 = vpop.f32.mrf.mxu0 }
 0x1fd   : > { %v474_v11 = vadd.f32 %v1516_v30, %v473_v6 }
 0x1ff   : > { %v1582_v12 = vmax.f32 %v474_v11, 0.0  ;;  %v1645_v11 = vmax.f32 %v468_v60, 0.0 }
 0x201   : > { %v585_v7 = vmul.f32 %v1582_v12, %v1582_v12  ;;  %2397 = vst [vmem:[#allocation9_spill] sm:$0xff] %v1645_v11 }
 0x203   : > { %625 = vadd.xlane.f32.xlu1 %v585_v7  ;;  %v583_v7 = vmul.f32 %v1645_v11, %v1645_v11 }
 0x204   : > { %v476_v8 = vpop.f32.mrf.mxu0 }
 0x205   : > { %v477_v13 = vadd.f32 %v1516_v30, %v476_v8 }
 0x207   : > { %v1587_v14 = vmax.f32 %v477_v13, 0.0  ;;  %v1651_v13 = vmax.f32 %v465_v5, 0.0 }
 0x209   : > { %v586_v9 = vmul.f32 %v1587_v14, %v1587_v14  ;;  %2398 = vst [vmem:[#allocation10_spill] sm:$0xff] %v1651_v13  ;;  %v582_v3 = vmul.f32 %v1651_v13, %v1651_v13 }
 0x20b   : > { %627 = vadd.xlane.f32.xlu1 %v586_v9 }
 0x20c   : > { %v479_v10 = vpop.f32.mrf.mxu0 }
 0x20d   : > { %v480_v15 = vadd.f32 %v1516_v30, %v479_v10  ;;  %v462_v10 = vadd.f32 %v1516_v30, %v1571_v2 }
 0x20f   : > { %v1592_v16 = vmax.f32 %v480_v15, 0.0 }
 0x211   : > { %v587_v17 = vmul.f32 %v1592_v16, %v1592_v16 }
 0x213   : > { %629 = vadd.xlane.f32.xlu1 %v587_v17 }
 0x214   : > { %v482_v18 = vpop.f32.mrf.mxu0 }
 0x215   : > { %v483_v19 = vadd.f32 %v1516_v30, %v482_v18  ;;  %v1662_v18 = vmax.f32 %v462_v10, 0.0 }
 0x217   : > { %v1597_v20 = vmax.f32 %v483_v19, 0.0  ;;  %2400 = vst [vmem:[#allocation12_spill] sm:$0xff] %v1662_v18 }
 0x219   : > { %v588_v21 = vmul.f32 %v1597_v20, %v1597_v20 }
 0x21b   : > { %631 = vadd.xlane.f32.xlu1 %v588_v21 }
 0x21c   : > { %v485_v22 = vpop.f32.mrf.mxu0 }
 0x21d   : > { %v486_v23 = vadd.f32 %v1516_v30, %v485_v22  ;;  %v459_v22 = vadd.f32 %v1516_v30, %v1567_v1 }
 0x21f   : > { %v1602_v24 = vmax.f32 %v486_v23, 0.0  ;;  %v581_v23 = vmul.f32 %v1662_v18, %v1662_v18 }
 0x221   : > { %v589_v25 = vmul.f32 %v1602_v24, %v1602_v24 }
 0x223   : > { %633 = vadd.xlane.f32.xlu1 %v589_v25 }
 0x224   : > { %v488_v26 = vpop.f32.mrf.mxu1 }
 0x225   : > { %v489_v27 = vadd.f32 %v1516_v30, %v488_v26  ;;  %v1673_v26 = vmax.f32 %v459_v22, 0.0 }
 0x227   : > { %v1607_v29 = vmax.f32 %v489_v27, 0.0  ;;  %2402 = vst [vmem:[#allocation14_spill] sm:$0xff] %v1673_v26 }
 0x229   : > { %v590_v31 = vmul.f32 %v1607_v29, %v1607_v29 }
 0x22b   : > { %635 = vadd.xlane.f32.xlu1 %v590_v31 }
 0x22c   : > { %v491_v34 = vpop.f32.mrf.mxu1 }
 0x22d   : > { %v492_v35 = vadd.f32 %v1516_v30, %v491_v34  ;;  %v580_v34 = vmul.f32 %v1673_v26, %v1673_v26 }
 0x22f   : > { %v1612_v36 = vmax.f32 %v492_v35, 0.0  ;;  %v658_v35 = vpop.xlane.xlu2 %657 }
 0x231   : > { %v591_v39 = vmul.f32 %v1612_v36, %v1612_v36 }
 0x233   : > { %637 = vadd.xlane.f32.xlu2 %v591_v39  ;;  %v1684_v39 = vmax.f32 %v456_v32, 0.0 }
 0x234   : > { %v494_v40 = vpop.f32.mrf.mxu1 }
 0x235   : > { %v495_v42 = vadd.f32 %v1516_v30, %v494_v40  ;;  %2404 = vst [vmem:[#allocation16_spill] sm:$0xff] %v1684_v39  ;;  %v579_v47 = vmul.f32 %v1684_v39, %v1684_v39 }
 0x237   : > { %v1620_v45 = vmax.f32 %v495_v42, 0.0 }
 0x239   : > { %v592_v50 = vmul.f32 %v1620_v45, %v1620_v45 }
 0x23b   : > { %669 = vadd.xlane.f32.xlu2 %v607_v49  ;;  %639 = vadd.xlane.f32.xlu1 %v592_v50  ;;  %v1696_v49 = vmax.f32 %v453_v44, 0.0  ;;  %v660_v50 = vpop.xlane.xlu2 %659 }
 0x23c   : > { %v1629_v51 = vpop.f32.mrf.mxu1 }
 0x23d   : > { %2406 = vst [vmem:[#allocation18_spill] sm:$0xff] %v1696_v49 }
 0x243   : > { %655 = vadd.xlane.f32.xlu2 %v600_v28  ;;  %671 = vadd.xlane.f32.xlu1 %v608_v56  ;;  %v450_v56 = vadd.f32 %v1516_v30, %v1555_v62 }
 0x244   : > { %v500_v57 = vpop.f32.mrf.mxu1 }
 0x245   : > { %v501_v63 = vadd.f32 %v1516_v30, %v500_v57 }
 0x247   : > { %v1709_v5 = vmax.f32 %v501_v63, 0.0 }
 0x249   : > { %2409 = vst [vmem:[#allocation21_spill] sm:$0xff] %v1709_v5  ;;  %v594_v62 = vmul.f32 %v1709_v5, %v1709_v5 }
 0x24b   : > { %623 = vadd.xlane.f32.xlu1 %v584_v61  ;;  %v578_v61 = vmul.f32 %v1696_v49, %v1696_v49 }
 0x24c   : > { %v503_v6 = vpop.f32.mrf.mxu1 }
 0x24d   : > { %v504_v0 = vadd.f32 %v1516_v30, %v503_v6  ;;  %v1707_v6 = vmax.f32 %v450_v56, 0.0 }
 0x24f   : > { %v1698_v55 = vmax.f32 %v504_v0, 0.0  ;;  %2408 = vst [vmem:[#allocation20_spill] sm:$0xff] %v1707_v6  ;;  %v577_v57 = vmul.f32 %v1707_v6, %v1707_v6 }
 0x251   : > { %2407 = vst [vmem:[#allocation19_spill] sm:$0xff] %v1698_v55  ;;  %v595_v60 = vmul.f32 %v1698_v55, %v1698_v55 }
 0x253   : > { %621 = vadd.xlane.f32.xlu1 %v583_v7 }
 0x254   : > { %v506_v8 = vpop.f32.mrf.mxu1 }
 0x255   : > { %v507_v9 = vadd.f32 %v1516_v30, %v506_v8  ;;  %v662_v8 = vpop.xlane.xlu2 %661 }
 0x257   : > { %v1654_v4 = vmax.f32 %v507_v9, 0.0  ;;  %v498_v9 = vadd.f32 %v1516_v30, %v1629_v51  ;;  %v1721_v51 = vmax.f32 %v658_v35, 1e-24  ;;  %v1739_v35 = vmax.f32 %v662_v8, 1e-24 }
 0x259   : > { %2399 = vst [vmem:[#allocation11_spill] sm:$0xff] %v1654_v4  ;;  %v596_v15 = vmul.f32 %v1654_v4, %v1654_v4  ;;  %v1717_v10 = vmax.f32 %v498_v9, 0.0  ;;  %1341 = vrsqrt.f32 %v1721_v51 }
 0x25a   : > { %2411 = vst [vmem:[#allocation23_spill] sm:$0xff] %v1721_v51 }
 0x25b   : > { %647 = vadd.xlane.f32.xlu2 %v596_v15  ;;  %619 = vadd.xlane.f32.xlu1 %v582_v3  ;;  %2410 = vst [vmem:[#allocation22_spill] sm:$0xff] %v1717_v10 }
 0x25c   : > { %v509_v17 = vpop.f32.mrf.mxu1  ;;  %2412 = vst [vmem:[#allocation24_spill] sm:$0xff] %v1739_v35 }
 0x25d   : > { %v510_v19 = vadd.f32 %v1516_v30, %v509_v17  ;;  %v664_v3 = vpop.xlane.xlu2 %663  ;;  %v593_v17 = vmul.f32 %v1717_v10, %v1717_v10 }
 0x25e   : > { %v1742_v44 = vmax.f32 %v664_v3, 1e-24 }
 0x25f   : > { %v1665_v21 = vmax.f32 %v510_v19, 0.0 }
 0x260   : > { %2413 = vst [vmem:[#allocation25_spill] sm:$0xff] %v1742_v44 }
 0x261   : > { %2401 = vst [vmem:[#allocation13_spill] sm:$0xff] %v1665_v21  ;;  %v597_v2 = vmul.f32 %v1665_v21, %v1665_v21 }
 0x263   : > { %649 = vadd.xlane.f32.xlu2 %v597_v2  ;;  %617 = vadd.xlane.f32.xlu1 %v581_v23 }
 0x264   : > { %v512_v25 = vpop.f32.mrf.mxu1 }
 0x265   : > { %v513_v27 = vadd.f32 %v1516_v30, %v512_v25  ;;  %v666_v22 = vpop.xlane.xlu2 %665 }
 0x266   : > { %v1723_v23 = vmax.f32 %v666_v22, 1e-24 }
 0x267   : > { %v1676_v31 = vmax.f32 %v513_v27, 0.0 }
 0x268   : > { %1343 = vrsqrt.f32 %v1723_v23 }
 0x269   : > { %2403 = vst [vmem:[#allocation15_spill] sm:$0xff] %v1676_v31  ;;  %v598_v1 = vmul.f32 %v1676_v31, %v1676_v31 }
 0x26b   : > { %651 = vadd.xlane.f32.xlu2 %v598_v1  ;;  %615 = vadd.xlane.f32.xlu1 %v580_v34 }
 0x26c   : > { %v515_v37 = vpop.f32.mrf.mxu1 }
 0x26d   : > { %v516_v40 = vadd.f32 %v1516_v30, %v515_v37  ;;  %v668_v30 = vpop.xlane.xlu2 %667 }
 0x26e   : > { %v1725_v25 = vmax.f32 %v668_v30, 1e-24 }
 0x26f   : > { %v1687_v42 = vmax.f32 %v516_v40, 0.0 }
 0x270   : > { %1345 = vrsqrt.f32 %v1725_v25 }
 0x271   : > { %2405 = vst [vmem:[#allocation17_spill] sm:$0xff] %v1687_v42  ;;  %v599_v46 = vmul.f32 %v1687_v42, %v1687_v42 }
 0x273   : > { %653 = vadd.xlane.f32.xlu2 %v599_v46  ;;  %613 = vadd.xlane.f32.xlu1 %v579_v47  ;;  %v1747_v46 = vpop.eup %1341 }
 0x274   : > { %v1818_v18 = vmul.f32 %v1747_v46, %v1721_v51 }
 0x276   : > { %v626_v28 = vpop.xlane.xlu1 %625 }
 0x277   : > { %v1727_v32 = vmax.f32 %v626_v28, 1e-24  ;;  %v1752_v28 = vpop.eup %1343 }
 0x278   : > { %v1757_v63 = vpop.eup %1345 }
 0x279   : > { %1347 = vrsqrt.f32 %v1727_v32  ;;  %v996_v22 = vmul.f32 %v1757_v63, %v1725_v25  ;;  %vm1002_vm1 = vweird.f32 %v1757_v63 }
 0x27b   : > { %645 = vadd.xlane.f32.xlu2 %v595_v60  ;;  %611 = vadd.xlane.f32.xlu1 %v578_v61  ;;  %v1759_v60 = vmax.f32 %v660_v50, 1e-24  ;;  %v997_v31 = vmul.f32 %v1757_v63, %v996_v22 }
 0x27d   : > { %2414 = vst [vmem:[#allocation26_spill] sm:$0xff] %v1759_v60  ;;  %v1835_v48 = vmul.f32 0.5, %v997_v31 }
 0x27e   : > { %v628_v7 = vpop.xlane.xlu1 %627 }
 0x27f   : > { %v1730_v1 = vmax.f32 %v628_v7, 1e-24  ;;  %v1762_v61 = vpop.eup %1347 }
 0x280   : > { %vm792_vm12 = vweird.f32 %v1762_v61 }
 0x281   : > { %1349 = vrsqrt.f32 %v1730_v1 }
 0x283   : > { %643 = vadd.xlane.f32.xlu2 %v594_v62  ;;  %609 = vadd.xlane.f32.xlu1 %v577_v57 }
 0x286   : > { %v630_v15 = vpop.xlane.xlu1 %629 }
 0x287   : > { %v1749_v47 = vmax.f32 %v630_v15, 1e-24  ;;  %v1765_v7 = vpop.eup %1349 }
 0x288   : > { %vm802_vm11 = vweird.f32 %v1765_v7 }
 0x28b   : > { %641 = vadd.xlane.f32.xlu2 %v593_v17 }
 0x28e   : > { %v632_v19 = vpop.xlane.xlu1 %631 }
 0x28f   : > { %v1754_v56 = vmax.f32 %v632_v19, 1e-24  ;;  %v986_v19 = vmul.f32 %v1752_v28, %v1723_v23 }
 0x291   : > { %v987_v21 = vmul.f32 %v1752_v28, %v986_v19  ;;  %vm821_vm13 = vweird.f32 %v1754_v56 }
 0x293   : > { %v1833_v51 = vmul.f32 0.5, %v987_v21 }
 0x296   : > { %v634_v2 = vpop.xlane.xlu1 %633 }
 0x297   : > { %v1736_v37 = vmax.f32 %v634_v2, 1e-24 }
 0x299   : > { %vm831_vm0 = vweird.f32 %v1736_v37 }
 0x29e   : > { %v636_v27 = vpop.xlane.xlu1 %635 }
 0x29f   : > { %v1733_v34 = vmax.f32 %v636_v27, 1e-24 }
 0x2a1   : > { %1351 = vrsqrt.f32 %v1733_v34  ;;  %vm841_vm8 = vweird.f32 %v1733_v34 }
 0x2a2   : > { %1353 = vrsqrt.f32 %v1736_v37 }
 0x2a6   : > { %v638_v40 = vpop.xlane.xlu2 %637 }
 0x2a7   : > { %v1745_v0 = vmax.f32 %v638_v40, 1e-24  ;;  %v1768_v8 = vpop.eup %1351  ;;  %v786_v40 = vmul.f32 %v1762_v61, %v1727_v32 }
 0x2a8   : > { %v1771_v9 = vpop.eup %1353  ;;  %v836_v2 = vmul.f32 %v1768_v8, %v1733_v34  ;;  %vm842_vm6 = vweird.f32 %v1768_v8 }
 0x2a9   : > { %1355 = vrsqrt.f32 %v1745_v0  ;;  %v826_v10 = vmul.f32 %v1771_v9, %v1736_v37  ;;  %v787_v42 = vmul.f32 %v1762_v61, %v786_v40  ;;  %vm851_vm4 = vweird.f32 %v1745_v0  ;;  %vm1887_vm14 = vmor %vm841_vm8, %vm842_vm6 }
 0x2aa   : > { %1357 = vrsqrt.f32 %v1739_v35  ;;  %v837_v39 = vmul.f32 %v1768_v8, %v836_v2  ;;  %vm832_vm10 = vweird.f32 %v1771_v9  ;;  %vm811_vm8 = vweird.f32 %v1749_v47 }
 0x2ab   : > { %1359 = vrsqrt.f32 %v1742_v44  ;;  %v827_v19 = vmul.f32 %v1771_v9, %v826_v10  ;;  %v1837_v10 = vmul.f32 0.5, %v787_v42 }
 0x2ac   : > { %1361 = vrsqrt.f32 %v1749_v47  ;;  %v838_v11 = vmul.f32 0.5, %v837_v39 }
 0x2ad   : > { %1363 = vrsqrt.f32 %v1754_v56 }
 0x2ae   : > { %1365 = vrsqrt.f32 %v1759_v60  ;;  %v670_v50 = vpop.xlane.xlu2 %669  ;;  %v640_v62 = vpop.xlane.xlu1 %639 }
 0x2af   : > { %v1774_v57 = vpop.eup %1355  ;;  %v1776_v15 = vmax.f32 %v670_v50, 1e-24  ;;  %v1778_v3 = vmax.f32 %v640_v62, 1e-24  ;;  %v796_v50 = vmul.f32 %v1765_v7, %v1730_v1 }
 0x2b0   : > { %v1780_v17 = vpop.eup %1357  ;;  %v846_v30 = vmul.f32 %v1774_v57, %v1745_v0  ;;  %vm852_vm2 = vweird.f32 %v1774_v57 }
 0x2b1   : > { %2415 = vst [vmem:[#allocation27_spill] sm:$0xff] %v1780_v17  ;;  %v1790_v27 = vpop.eup %1359  ;;  %1367 = vrsqrt.f32 %v1776_v15  ;;  %v966_v6 = vmul.f32 %v1780_v17, %v1739_v35  ;;  %v797_v26 = vmul.f32 %v1765_v7, %v796_v50  ;;  %vm861_vm5 = vweird.f32 %v1778_v3  ;;  %vm1869_vm7 = vmor %vm851_vm4, %vm852_vm2 }
 0x2b2   : > { %2416 = vst [vmem:[#allocation28_spill] sm:$0xff] %v1790_v27  ;;  %v1797_v62 = vpop.eup %1361  ;;  %1369 = vrsqrt.f32 %v1778_v3  ;;  %v847_v55 = vmul.f32 %v1774_v57, %v846_v30  ;;  %v976_v49 = vmul.f32 %v1790_v27, %v1742_v44  ;;  %v839_v44 = vsub.f32 1.5, %v838_v11  ;;  %vm1903_vm2 = vmor %vm831_vm0, %vm832_vm10 }
 0x2b3   : > { %v1802_v5 = vpop.eup %1363  ;;  %v806_v30 = vmul.f32 %v1797_v62, %v1749_v47  ;;  %v967_v40 = vmul.f32 %v1780_v17, %v966_v6  ;;  %v798_v35 = vmul.f32 0.5, %v797_v26  ;;  %v828_v6 = vmul.f32 0.5, %v827_v19  ;;  %v2446_v47 = vld [vmem:[#allocation24_spill] sm:$0xff] }
 0x2b4   : > { %v1807_v4 = vpop.eup %1365  ;;  %v816_v52 = vmul.f32 %v1802_v5, %v1754_v56  ;;  %v848_v50 = vmul.f32 0.5, %v847_v55  ;;  %v977_v43 = vmul.f32 %v1790_v27, %v976_v49  ;;  %v999_v17 = vsub.f32 1.5, %v1835_v48 }
 0x2b5   : > { %2417 = vst [vmem:[#allocation29_spill] sm:$0xff] %v1807_v4  ;;  %v956_v2 = vmul.f32 %v1807_v4, %v1759_v60  ;;  %v807_v55 = vmul.f32 %v1797_v62, %v806_v30  ;;  %v1848_v31 = vmul.f32 0.5, %v967_v40  ;;  %v789_v30 = vsub.f32 1.5, %v1837_v10 }
 0x2b6   : > { %v672_v33 = vpop.xlane.xlu1 %671  ;;  %v849_v39 = vsub.f32 1.5, %v848_v50  ;;  %v1850_v26 = vmul.f32 0.5, %v977_v43  ;;  %vm812_vm15 = vweird.f32 %v1797_v62  ;;  %vm801_vm10 = vweird.f32 %v1730_v1 }
 0x2b7   : > { %v1825_v22 = vpop.eup %1367  ;;  %v1830_v13 = vmax.f32 %v672_v33, 1e-24  ;;  %v817_v33 = vmul.f32 %v1802_v5, %v816_v52  ;;  %v1846_v21 = vmul.f32 %v1807_v4, %v956_v2  ;;  %v799_v52 = vsub.f32 1.5, %v798_v35 }
 0x2b8   : > { %v1370_v38 = vpop.eup %1369  ;;  %v1006_v53 = vmul.f32 %v1825_v22, %v1776_v15  ;;  %v808_v58 = vmul.f32 0.5, %v807_v55  ;;  %v829_v4 = vsub.f32 1.5, %v828_v6  ;;  %v850_v50 = vmul.f32 %v1774_v57, %v849_v39 }
 0x2b9   : > { %v856_v60 = vmul.f32 %v1370_v38, %v1778_v3  ;;  %1371 = vrsqrt.f32 %v1830_v13  ;;  %v818_v2 = vmul.f32 0.5, %v817_v33  ;;  %vm862_vm3 = vweird.f32 %v1370_v38 }
 0x2ba   : > { %v1007_v19 = vmul.f32 %v1825_v22, %v1006_v53  ;;  %v840_v53 = vmul.f32 %v1768_v8, %v839_v44  ;;  %v809_v33 = vsub.f32 1.5, %v808_v58  ;;  %vm863_vm9 = vmor %vm861_vm5, %vm862_vm3  ;;  %v854_v3 = vsel %vm1869_vm7, %v1774_v57, %v850_v50  ;;  %v656_v57 = vpop.xlane.xlu2 %655 }
 0x2bb   : > { %v857_v42 = vmul.f32 %v1370_v38, %v856_v60  ;;  %v819_v6 = vsub.f32 1.5, %v818_v2  ;;  %v830_v39 = vmul.f32 %v1771_v9, %v829_v4  ;;  %v1039_v2 = vmul.f32 %v854_v3, %v1612_v36 }
 0x2bc   : > { %v1008_v11 = vmul.f32 0.5, %v1007_v19  ;;  %vm822_vm3 = vweird.f32 %v1802_v5  ;;  %vm1012_vm5 = vweird.f32 %v1825_v22  ;;  %vm1021_vm6 = vweird.f32 %v1830_v13 }
 0x2bd   : > { %v858_v27 = vmul.f32 0.5, %v857_v42  ;;  %v820_v37 = vmul.f32 %v1802_v5, %v819_v6  ;;  %v834_v36 = vsel %vm1903_vm2, %v1771_v9, %v830_v39  ;;  %vm1931_vm7 = vmor %vm821_vm13, %vm822_vm3  ;;  %vm1011_vm13 = vweird.f32 %v1776_v15 }
 0x2be   : > { %v624_v40 = vpop.xlane.xlu1 %623  ;;  %v1009_v4 = vsub.f32 1.5, %v1008_v11  ;;  %vm791_vm0 = vweird.f32 %v1727_v32  ;;  %vm1976_vm2 = vmor %vm801_vm10, %vm802_vm11 }
 0x2bf   : > { %v859_v60 = vsub.f32 1.5, %v858_v27  ;;  %v1857_v43 = vmax.f32 %v624_v40, 1e-24  ;;  %v1860_v49 = vpop.eup %1371  ;;  %v810_v40 = vmul.f32 %v1797_v62, %v809_v33  ;;  %v824_v56 = vsel %vm1931_vm7, %v1802_v5, %v820_v37  ;;  %vm1993_vm11 = vmor %vm791_vm0, %vm792_vm12 }
 0x2c0   : > { %v1016_v35 = vmul.f32 %v1860_v49, %v1830_v13  ;;  %vm1022_vm4 = vweird.f32 %v1860_v49  ;;  %v1010_v55 = vmul.f32 %v1825_v22, %v1009_v4  ;;  %v1037_v13 = vmul.f32 %v834_v36, %v1602_v24 }
 0x2c1   : > { %1373 = vrsqrt.f32 %v1857_v43  ;;  %v860_v27 = vmul.f32 %v1370_v38, %v859_v60  ;;  %v790_v24 = vmul.f32 %v1762_v61, %v789_v30  ;;  %v1036_v10 = vmul.f32 %v824_v56, %v1597_v20 }
 0x2c2   : > { %v1017_v44 = vmul.f32 %v1860_v49, %v1016_v35  ;;  %v979_v30 = vsub.f32 1.5, %v1850_v26  ;;  %vm781_vm12 = vweird.f32 %v1857_v43  ;;  %vm991_vm7 = vweird.f32 %v1723_v23 }
 0x2c3   : > { %v864_v0 = vsel %vm863_vm9, %v1370_v38, %v860_v27  ;;  %v1893_v38 = vmul.f32 %v1765_v7, %v799_v52  ;;  %vm1023_vm9 = vmor %vm1021_vm6, %vm1022_vm4  ;;  %vm1001_vm4 = vweird.f32 %v1725_v25 }
 0x2c4   : > { %v1040_v58 = vmul.f32 %v864_v0, %v1620_v45  ;;  %v1018_v42 = vmul.f32 0.5, %v1017_v44  ;;  %v844_v45 = vsel %vm1887_vm14, %v1768_v8, %v840_v53  ;;  %v1918_v53 = vmax.f32 %v656_v57, 1e-24  ;;  %vm1949_vm14 = vmor %vm811_vm8, %vm812_vm15 }
 0x2c5   : > { %v1038_v35 = vmul.f32 %v844_v45, %v1607_v29  ;;  %v814_v1 = vsel %vm1949_vm14, %v1797_v62, %v810_v40  ;;  %vm1965_vm15 = vmor %vm1011_vm13, %vm1012_vm5  ;;  %v1000_v62 = vmul.f32 %v1757_v63, %v999_v17  ;;  %v969_v57 = vsub.f32 1.5, %v1848_v31  ;;  %v2437_v45 = vld [vmem:[#allocation7_spill] sm:$0xff] }
 0x2c6   : > { %1062 = vmatpush.xpose.msrb.mxu1 %v1040_v58  ;;  %1136 = vmatpush.msra.mxu3 %v1040_v58  ;;  %v622_v19 = vpop.xlane.xlu1 %621  ;;  %v1019_v60 = vsub.f32 1.5, %v1018_v42  ;;  %v1035_v0 = vmul.f32 %v814_v1, %v1592_v16  ;;  %vm2015_vm5 = vmor %vm1001_vm4, %vm1002_vm1  ;;  %vm992_vm1 = vweird.f32 %v1752_v28  ;;  %v2447_v1 = vld [vmem:[#allocation9_spill] sm:$0xff] }
 0x2c7   : > { %v1910_v8 = vpop.eup %1373  ;;  %v1912_v50 = vmax.f32 %v622_v19, 1e-24  ;;  %vm2055_vm8 = vmor %vm991_vm7, %vm992_vm1 }
 0x2c8   : > { %v776_v11 = vmul.f32 %v1910_v8, %v1857_v43  ;;  %1137 = vmatpush.msra.mxu3 %v1039_v2  ;;  %v1020_v27 = vmul.f32 %v1860_v49, %v1019_v60  ;;  %vm782_vm3 = vweird.f32 %v1910_v8  ;;  %v2441_v60 = vld [vmem:[#allocation25_spill] sm:$0xff] }
 0x2c9   : > { %1375 = vrsqrt.f32 %v1912_v50  ;;  %vm783_vm6 = vmor %vm781_vm12, %vm782_vm3  ;;  %vm981_vm13 = vweird.f32 %v2441_v60  ;;  %vm771_vm14 = vweird.f32 %v1912_v50 }
 0x2ca   : > { %v777_v29 = vmul.f32 %v1910_v8, %v776_v11  ;;  %1063 = vmatpush.xpose.msrb.mxu1 %v1039_v2  ;;  %1138 = vmatpush.msra.mxu3 %v1038_v35  ;;  %v1024_v33 = vsel %vm1023_vm9, %v1860_v49, %v1020_v27  ;;  %1377 = vrsqrt.f32 %v1918_v53  ;;  %v1014_v49 = vsel %vm1965_vm15, %v1825_v22, %v1010_v55  ;;  %v2442_v11 = vld [vmem:[#allocation6_spill] sm:$0xff]  ;;  %v2445_v55 = vld [vmem:[#allocation27_spill] sm:$0xff] }
 0x2cb   : > { %v1958_v5 = vmul.f32 %v1024_v33, %v1633_v54  ;;  %v804_v22 = vsel %vm1976_vm2, %v1765_v7, %v1893_v38  ;;  %v794_v7 = vsel %vm1993_vm11, %v1762_v61, %v790_v24  ;;  %v2011_v39 = vmul.f32 %v1014_v49, %v1617_v41  ;;  %v2448_v54 = vld [vmem:[#allocation5_spill] sm:$0xff] }
 0x2cc   : > { %v778_v6 = vmul.f32 0.5, %v777_v29  ;;  %1139 = vmatpush.msra.mxu3 %v1037_v13  ;;  %v2021_v58 = vmul.f32 %v804_v22, %v1587_v14  ;;  %v1004_v61 = vsel %vm2015_vm5, %v1757_v63, %v1000_v62  ;;  %v2436_v41 = vsub.f32 1.5, %v1833_v51 }
 0x2cd   : > { %1082 = vmatpush.xpose.msrb.mxu2 %v1958_v5  ;;  %v947_v38 = vmul.f32 %v1747_v46, %v1818_v18  ;;  %v958_v51 = vmul.f32 0.5, %v1846_v21  ;;  %v2044_v4 = vmul.f32 %v794_v7, %v1582_v12  ;;  %v2051_v19 = vmul.f32 %v1004_v61, %v2437_v45 }
 0x2ce   : > { %v779_v44 = vsub.f32 1.5, %v778_v6  ;;  %1064 = vmatpush.xpose.msrb.mxu1 %v1038_v35  ;;  %v1985_v20 = vpop.xlane.xlu2 %647  ;;  %v620_v32 = vpop.xlane.xlu1 %619  ;;  %1140 = vmatpush.msra.mxu3 %v1036_v10  ;;  %v990_v43 = vmul.f32 %v1752_v28, %v2436_v41  ;;  %vm972_vm0 = vweird.f32 %v2445_v55  ;;  %v970_v56 = vmul.f32 %v2445_v55, %v969_v57 }
 0x2cf   : > { %v1998_v17 = vpop.eup %1375  ;;  %v2001_v26 = vmax.f32 %v620_v32, 1e-24  ;;  %v948_v40 = vmul.f32 0.5, %v947_v38  ;;  %vm971_vm11 = vweird.f32 %v2446_v47  ;;  %v2101_v24 = vmax.f32 %v1985_v20, 1e-24 }
 0x2d0   : > { %v766_v3 = vmul.f32 %v1998_v17, %v1912_v50  ;;  %v780_v16 = vmul.f32 %v1910_v8, %v779_v44  ;;  %1141 = vmatpush.msra.mxu3 %v1035_v0  ;;  %v2032_v34 = vpop.eup %1377  ;;  %v994_v12 = vsel %vm2055_vm8, %v1752_v28, %v990_v43  ;;  %vm772_vm10 = vweird.f32 %v1998_v17  ;;  %vm2114_vm3 = vmor %vm971_vm11, %vm972_vm0  ;;  %v2451_v44 = vld [vmem:[#allocation29_spill] sm:$0xff]  ;;  %v2454_v43 = vld [vmem:[#allocation4_spill] sm:$0xff] }
 0x2d1   : > { %1379 = vrsqrt.f32 %v2001_v26  ;;  %1083 = vmatpush.xpose.msrb.mxu2 %v2011_v39  ;;  %v936_v23 = vmul.f32 %v2032_v34, %v1918_v53  ;;  %v2077_v35 = vmul.f32 %v994_v12, %v2442_v11  ;;  %vm773_vm2 = vmor %vm771_vm14, %vm772_vm10  ;;  %vm962_vm4 = vweird.f32 %v2451_v44 }
 0x2d2   : > { %v767_v14 = vmul.f32 %v1998_v17, %v766_v3  ;;  %1065 = vmatpush.xpose.msrb.mxu1 %v1037_v13  ;;  %v784_v63 = vsel %vm783_vm6, %v1910_v8, %v780_v16  ;;  %1142 = vmatpush.msra.mxu3 %v2021_v58  ;;  %v959_v8 = vsub.f32 1.5, %v958_v51  ;;  %v974_v22 = vsel %vm2114_vm3, %v2445_v55, %v970_v56 }
 0x2d3   : > { %v2047_v18 = vmul.f32 %v784_v63, %v1640_v59  ;;  %v2440_v59 = vld [vmem:[#allocation28_spill] sm:$0xff]  ;;  %v937_v29 = vmul.f32 %v2032_v34, %v936_v23  ;;  %vm952_vm6 = vweird.f32 %v1747_v46  ;;  %v2136_v38 = vmul.f32 %v974_v22, %v2454_v43  ;;  %v2459_v23 = vld [vmem:[#allocation3_spill] sm:$0xff] }
 0x2d4   : > { %v768_v42 = vmul.f32 0.5, %v767_v14  ;;  %1143 = vmatpush.msra.mxu3 %v2044_v4  ;;  %v980_v31 = vmul.f32 %v2440_v59, %v979_v30  ;;  %vm982_vm9 = vweird.f32 %v2440_v59  ;;  %v960_v48 = vmul.f32 %v2451_v44, %v959_v8 }
 0x2d5   : > { %1084 = vmatpush.xpose.msrb.mxu2 %v2051_v19  ;;  %vm2081_vm15 = vmor %vm981_vm13, %vm982_vm9  ;;  %v938_v20 = vmul.f32 0.5, %v937_v29  ;;  %vm761_vm8 = vweird.f32 %v2001_v26  ;;  %vm942_vm13 = vweird.f32 %v2032_v34  ;;  %vm941_vm14 = vweird.f32 %v1918_v53  ;;  %v2461_v29 = vld [vmem:[#allocation2_spill] sm:$0xff] }
 0x2d6   : > { %v769_v2 = vsub.f32 1.5, %v768_v42  ;;  %1066 = vmatpush.xpose.msrb.mxu1 %v1036_v10  ;;  %v650_v52 = vpop.xlane.xlu2 %649  ;;  %v618_v37 = vpop.xlane.xlu1 %617  ;;  %1144 = vmatpush.msra.mxu3 %v2047_v18  ;;  %v984_v50 = vsel %vm2081_vm15, %v2440_v59, %v980_v31  ;;  %v949_v10 = vsub.f32 1.5, %v948_v40  ;;  %vm943_vm15 = vmor %vm941_vm14, %vm942_vm13 }
 0x2d7   : > { %v2071_v36 = vmax.f32 %v618_v37, 1e-24  ;;  %v2073_v28 = vpop.eup %1379  ;;  %v2107_v49 = vmax.f32 %v650_v52, 1e-24  ;;  %v2110_v62 = vmul.f32 %v984_v50, %v2448_v54  ;;  %v939_v63 = vsub.f32 1.5, %v938_v20 }
 0x2d8   : > { %v770_v9 = vmul.f32 %v1998_v17, %v769_v2  ;;  %v756_v13 = vmul.f32 %v2073_v28, %v2001_v26  ;;  %vm762_vm7 = vweird.f32 %v2073_v28  ;;  %v950_v14 = vmul.f32 %v1747_v46, %v949_v10  ;;  %v2460_v2 = vld [vmem:[#allocation10_spill] sm:$0xff] }
 0x2d9   : > { %1381 = vrsqrt.f32 %v2071_v36  ;;  %1085 = vmatpush.xpose.msrb.mxu2 %v2077_v35  ;;  %vm763_vm10 = vmor %vm761_vm8, %vm762_vm7  ;;  %v940_v37 = vmul.f32 %v2032_v34, %v939_v63 }
 0x2da   : > { %1067 = vmatpush.xpose.msrb.mxu1 %v1035_v0  ;;  %v774_v33 = vsel %vm773_vm2, %v1998_v17, %v770_v9  ;;  %v757_v6 = vmul.f32 %v2073_v28, %v756_v13  ;;  %v2452_v17 = vld [vmem:[#allocation23_spill] sm:$0xff]  ;;  %v2453_v0 = vld [vmem:[#allocation26_spill] sm:$0xff]  ;;  %1383 = vrsqrt.f32 %v2101_v24  ;;  %vm751_vm2 = vweird.f32 %v2071_v36 }
 0x2db   : > { %v2105_v15 = vmul.f32 %v774_v33, %v2447_v1  ;;  %vm951_vm12 = vweird.f32 %v2452_v17  ;;  %vm961_vm5 = vweird.f32 %v2453_v0  ;;  %1385 = vrsqrt.f32 %v2107_v49  ;;  %v2462_v1 = vld [vmem:[#allocation8_spill] sm:$0xff] }
 0x2dc   : > { %v758_v32 = vmul.f32 0.5, %v757_v6  ;;  %vm2140_vm1 = vmor %vm961_vm5, %vm962_vm4  ;;  %v944_v50 = vsel %vm943_vm15, %v2032_v34, %v940_v37 }
 0x2dd   : > { %1145 = vmatpush.msra.mxu3 %v2105_v15  ;;  %1086 = vmatpush.xpose.msrb.mxu2 %v2110_v62  ;;  %v964_v57 = vsel %vm2140_vm1, %v2451_v44, %v960_v48  ;;  %vm2160_vm9 = vmor %vm951_vm12, %vm952_vm6  ;;  %v2207_v10 = vmul.f32 %v944_v50, %v2462_v1  ;;  %v2463_v44 = vld [vmem:[#allocation12_spill] sm:$0xff] }
 0x2de   : > { %1068 = vmatpush.xpose.msrb.mxu1 %v2021_v58  ;;  %v652_v7 = vpop.xlane.xlu2 %651  ;;  %v616_v3 = vpop.xlane.xlu1 %615  ;;  %v759_v25 = vsub.f32 1.5, %v758_v32  ;;  %v2165_v26 = vmul.f32 %v964_v57, %v2459_v23  ;;  %v2464_v23 = vld [vmem:[#allocation14_spill] sm:$0xff] }
 0x2df   : > { %v2130_v16 = vmax.f32 %v652_v7, 1e-24  ;;  %v2132_v61 = vmax.f32 %v616_v3, 1e-24  ;;  %v1382_v41 = vpop.eup %1381 }
 0x2e0   : > { %v746_v51 = vmul.f32 %v1382_v41, %v2071_v36  ;;  %v760_v42 = vmul.f32 %v2073_v28, %v759_v25  ;;  %v2171_v59 = vpop.eup %1383  ;;  %vm752_vm0 = vweird.f32 %v1382_v41 }
 0x2e1   : > { %1387 = vrsqrt.f32 %v2130_v16  ;;  %1087 = vmatpush.xpose.msrb.mxu2 %v2136_v38  ;;  %v2176_v40 = vpop.eup %1385  ;;  %v896_v53 = vmul.f32 %v2171_v59, %v2101_v24  ;;  %vm753_vm11 = vmor %vm751_vm2, %vm752_vm0  ;;  %vm741_vm4 = vweird.f32 %v2132_v61  ;;  %vm921_vm8 = vweird.f32 %v2130_v16 }
 0x2e2   : > { %1389 = vrsqrt.f32 %v2132_v61  ;;  %1069 = vmatpush.xpose.msrb.mxu1 %v2044_v4  ;;  %v747_v21 = vmul.f32 %v1382_v41, %v746_v51  ;;  %v764_v12 = vsel %vm763_vm10, %v2073_v28, %v760_v42  ;;  %v954_v4 = vsel %vm2160_vm9, %v1747_v46, %v950_v14 }
 0x2e3   : > { %v1030_v52 = vmul.f32 %v764_v12, %v2460_v2  ;;  %v906_v56 = vmul.f32 %v2176_v40, %v2107_v49  ;;  %v897_v54 = vmul.f32 %v2171_v59, %v896_v53  ;;  %vm912_vm15 = vweird.f32 %v2176_v40 }
 0x2e4   : > { %v748_v31 = vmul.f32 0.5, %v747_v21  ;;  %vm911_vm0 = vweird.f32 %v2107_v49  ;;  %vm902_vm2 = vweird.f32 %v2171_v59 }
 0x2e5   : > { %1088 = vmatpush.xpose.msrb.mxu2 %v2165_v26  ;;  %1146 = vmatpush.msra.mxu3 %v1030_v52  ;;  %v907_v20 = vmul.f32 %v2176_v40, %v906_v56 }
 0x2e6   : > { %1070 = vmatpush.xpose.msrb.mxu1 %v2047_v18  ;;  %v654_v8 = vpop.xlane.xlu2 %653  ;;  %v614_v60 = vpop.xlane.xlu1 %613  ;;  %v749_v46 = vsub.f32 1.5, %v748_v31  ;;  %v2190_v18 = vmul.f32 %v954_v4, %v2461_v29 }
 0x2e7   : > { %v2180_v28 = vpop.eup %1387  ;;  %v2183_v11 = vmax.f32 %v654_v8, 1e-24  ;;  %v2185_v27 = vmax.f32 %v614_v60, 1e-24  ;;  %v908_v58 = vmul.f32 0.5, %v907_v20  ;;  %v2468_v20 = vld [vmem:[#allocation16_spill] sm:$0xff] }
 0x2e8   : > { %v1390_v9 = vpop.eup %1389  ;;  %v916_v55 = vmul.f32 %v2180_v28, %v2130_v16  ;;  %v750_v33 = vmul.f32 %v1382_v41, %v749_v46  ;;  %vm922_vm6 = vweird.f32 %v2180_v28 }
 0x2e9   : > { %v736_v13 = vmul.f32 %v1390_v9, %v2132_v61  ;;  %1391 = vrsqrt.f32 %v2183_v11  ;;  %1089 = vmatpush.xpose.msrb.mxu2 %v2190_v18  ;;  %vm742_vm3 = vweird.f32 %v1390_v9  ;;  %v909_v4 = vsub.f32 1.5, %v908_v58  ;;  %vm2254_vm13 = vmor %vm921_vm8, %vm922_vm6 }
 0x2ea   : > { %1393 = vrsqrt.f32 %v2185_v27  ;;  %1071 = vmatpush.xpose.msrb.mxu1 %v2105_v15  ;;  %v917_v6 = vmul.f32 %v2180_v28, %v916_v55  ;;  %v754_v34 = vsel %vm753_vm11, %v1382_v41, %v750_v33  ;;  %v2220_v41 = vmul.f32 0.5, %v897_v54  ;;  %vm743_vm12 = vmor %vm741_vm4, %vm742_vm3 }
 0x2eb   : > { %v737_v47 = vmul.f32 %v1390_v9, %v736_v13  ;;  %v1029_v36 = vmul.f32 %v754_v34, %v2463_v44  ;;  %vm931_vm1 = vweird.f32 %v2183_v11  ;;  %vm731_vm9 = vweird.f32 %v2185_v27  ;;  %vm2284_vm3 = vmor %vm911_vm0, %vm912_vm15 }
 0x2ec   : > { %v918_v3 = vmul.f32 0.5, %v917_v6  ;;  %v899_v21 = vsub.f32 1.5, %v2220_v41  ;;  %v1425_v44 = vmov 0   ;;  %vm901_vm4 = vweird.f32 %v2101_v24 }
 0x2ed   : > { %v738_v30 = vmul.f32 0.5, %v737_v47  ;;  %1090 = vmatpush.xpose.msrb.mxu2 %v2207_v10  ;;  %1147 = vmatpush.msra.mxu3 %v1029_v36  ;;  %v2467_v47 = vld [vmem:[#allocation17_spill] sm:$0xff] }
 0x2ee   : > { %1072 = vmatpush.xpose.msrb.mxu1 %v1030_v52  ;;  %v646_v15 = vpop.xlane.xlu2 %645  ;;  %v612_v32 = vpop.xlane.xlu1 %611  ;;  %v919_v57 = vsub.f32 1.5, %v918_v3  ;;  %1338 = vset.pattern.permute.xlu1 %v1425_v44  ;;  %v2469_v3 = vld [vmem:[#allocation15_spill] sm:$0xff] }
 0x2ef   : > { %v1392_v22 = vpop.eup %1391  ;;  %v739_v48 = vsub.f32 1.5, %v738_v30  ;;  %v2213_v17 = vmax.f32 %v646_v15, 1e-24  ;;  %v2215_v0 = vmax.f32 %v612_v32, 1e-24  ;;  %v910_v30 = vmul.f32 %v2176_v40, %v909_v4  ;;  %1339 = vset.pattern.permute.xlu0 %v1425_v44 }
 0x2f0   : > { %v2217_v7 = vpop.eup %1393  ;;  %v926_v25 = vmul.f32 %v1392_v22, %v2183_v11  ;;  %vm932_vm5 = vweird.f32 %v1392_v22  ;;  %v920_v53 = vmul.f32 %v2180_v28, %v919_v57  ;;  %v255_v11 = vld [vmem:[%s2355_s4] sm:$0xff] }
 0x2f1   : > { %v726_v43 = vmul.f32 %v2217_v7, %v2185_v27  ;;  %1395 = vrsqrt.f32 %v2213_v17  ;;  %v740_v63 = vmul.f32 %v1390_v9, %v739_v48  ;;  %vm732_vm7 = vweird.f32 %v2217_v7  ;;  %vm933_vm10 = vmor %vm931_vm1, %vm932_vm5  ;;  %1059 = vperm.xlu1 %1338, %v255_v11   ;;  %v254_v11 = vld [vmem:[%s2354_s3] sm:$0xff] }
 0x2f2   : > { %v927_v14 = vmul.f32 %v1392_v22, %v926_v25  ;;  %1397 = vrsqrt.f32 %v2215_v0  ;;  %1073 = vmatpush.xpose.msrb.mxu1 %v1029_v36  ;;  %vm733_vm14 = vmor %vm731_vm9, %vm732_vm7  ;;  %v924_v54 = vsel %vm2254_vm13, %v2180_v28, %v920_v53  ;;  %vm891_vm7 = vweird.f32 %v2213_v17 }
 0x2f3   : > { %v727_v51 = vmul.f32 %v2217_v7, %v726_v43  ;;  %v744_v45 = vsel %vm743_vm12, %v1390_v9, %v740_v63  ;;  %v2280_v25 = vmul.f32 %v924_v54, %v2469_v3  ;;  %vm721_vm12 = vweird.f32 %v2215_v0  ;;  %vm2300_vm5 = vmor %vm901_vm4, %vm902_vm2 }
 0x2f4   : > { %v928_v42 = vmul.f32 0.5, %v927_v14  ;;  %v1028_v12 = vmul.f32 %v744_v45, %v2464_v23  ;;  %v914_v14 = vsel %vm2284_vm3, %v2176_v40, %v910_v30  ;;  %v2474_v45 = vld [vmem:[#allocation13_spill] sm:$0xff]  ;;  %v2475_v23 = vld [vmem:[#allocation18_spill] sm:$0xff] }
 0x2f5   : > { %v728_v61 = vmul.f32 0.5, %v727_v51  ;;  %v2480_v30 = vld [vmem:[#allocation22_spill] sm:$0xff] }
 0x2f6   : > { %v929_v31 = vsub.f32 1.5, %v928_v42  ;;  %v644_v2 = vpop.xlane.xlu2 %643  ;;  %v610_v52 = vpop.xlane.xlu1 %609  ;;  %1074 = vmatpush.xpose.msrb.mxu1 %v1028_v12  ;;  %1148 = vmatpush.msra.mxu3 %v1028_v12 }
 0x2f7   : > { %v2231_v37 = vpop.eup %1395  ;;  %v729_v8 = vsub.f32 1.5, %v728_v61  ;;  %v2234_v60 = vmax.f32 %v644_v2, 1e-24  ;;  %v2236_v46 = vmax.f32 %v610_v52, 1e-24 }
 0x2f8   : > { %v1398_v9 = vpop.eup %1397  ;;  %v886_v55 = vmul.f32 %v2231_v37, %v2213_v17  ;;  %v930_v29 = vmul.f32 %v1392_v22, %v929_v31  ;;  %vm892_vm1 = vweird.f32 %v2231_v37 }
 0x2f9   : > { %v716_v13 = vmul.f32 %v1398_v9, %v2215_v0  ;;  %1399 = vrsqrt.f32 %v2234_v60  ;;  %v730_v56 = vmul.f32 %v2217_v7, %v729_v8  ;;  %vm722_vm11 = vweird.f32 %v1398_v9  ;;  %vm893_vm9 = vmor %vm891_vm7, %vm892_vm1 }
 0x2fa   : > { %v887_v50 = vmul.f32 %v2231_v37, %v886_v55  ;;  %1401 = vrsqrt.f32 %v2236_v46  ;;  %v934_v33 = vsel %vm933_vm10, %v1392_v22, %v930_v29  ;;  %v900_v22 = vmul.f32 %v2171_v59, %v899_v21  ;;  %vm723_vm6 = vmor %vm721_vm12, %vm722_vm11 }
 0x2fb   : > { %v717_v27 = vmul.f32 %v1398_v9, %v716_v13  ;;  %v2259_v6 = vmul.f32 %v934_v33, %v2467_v47  ;;  %v734_v34 = vsel %vm733_vm14, %v2217_v7, %v730_v56  ;;  %v1045_v0 = vmul.f32 %v914_v14, %v2474_v45  ;;  %v2477_v56 = vld [vmem:[#allocation19_spill] sm:$0xff] }
 0x2fc   : > { %v888_v1 = vmul.f32 0.5, %v887_v50  ;;  %v1027_v15 = vmul.f32 %v734_v34, %v2468_v20  ;;  %v904_v21 = vsel %vm2300_vm5, %v2171_v59, %v900_v22  ;;  %vm711_vm10 = vweird.f32 %v2236_v46 }
 0x2fd   : > { %v718_v36 = vmul.f32 0.5, %v717_v27  ;;  %1091 = vmatpush.xpose.msrb.mxu2 %v2259_v6  ;;  %vm881_vm15 = vweird.f32 %v2234_v60  ;;  %v2478_v27 = vld [vmem:[#allocation20_spill] sm:$0xff] }
 0x2fe   : > { %v642_v32 = vpop.xlane.xlu2 %641  ;;  %1075 = vmatpush.xpose.msrb.mxu1 %v1027_v15  ;;  %1149 = vmatpush.msra.mxu3 %v1027_v15  ;;  %v889_v43 = vsub.f32 1.5, %v888_v1 }
 0x2ff   : > { %v2275_v48 = vpop.eup %1399  ;;  %v719_v28 = vsub.f32 1.5, %v718_v36  ;;  %v2277_v7 = vmax.f32 %v642_v32, 1e-24 }
 0x300   : > { %v1402_v41 = vpop.eup %1401  ;;  %v876_v58 = vmul.f32 %v2275_v48, %v2234_v60  ;;  %v890_v4 = vmul.f32 %v2231_v37, %v889_v43  ;;  %vm882_vm13 = vweird.f32 %v2275_v48  ;;  %v2479_v60 = vld [vmem:[#allocation21_spill] sm:$0xff] }
 0x301   : > { %v706_v63 = vmul.f32 %v1402_v41, %v2236_v46  ;;  %1403 = vrsqrt.f32 %v2277_v7  ;;  %1092 = vmatpush.xpose.msrb.mxu2 %v2280_v25  ;;  %v720_v51 = vmul.f32 %v1398_v9, %v719_v28  ;;  %vm712_vm8 = vweird.f32 %v1402_v41  ;;  %vm883_vm0 = vmor %vm881_vm15, %vm882_vm13 }
 0x302   : > { %v877_v57 = vmul.f32 %v2275_v48, %v876_v58  ;;  %v894_v29 = vsel %vm893_vm9, %v2231_v37, %v890_v4  ;;  %vm713_vm14 = vmor %vm711_vm10, %vm712_vm8  ;;  %vm871_vm11 = vweird.f32 %v2277_v7 }
 0x303   : > { %v707_v42 = vmul.f32 %v1402_v41, %v706_v63  ;;  %v724_v40 = vsel %vm723_vm6, %v1398_v9, %v720_v51  ;;  %v2476_v9 = vld [vmem:[#allocation11_spill] sm:$0xff]  ;;  %v1043_v33 = vmul.f32 %v894_v29, %v2477_v56  ;;  %vm1198_vm6 = vcmask 7168  }
 0x304   : > { %v878_v61 = vmul.f32 0.5, %v877_v57  ;;  %v1026_v12 = vmul.f32 %v724_v40, %v2475_v23  ;;  %v1044_v55 = vmul.f32 %v904_v21, %v2476_v9 }
 0x305   : > { %v708_v31 = vmul.f32 0.5, %v707_v42  ;;  %1093 = vmatpush.xpose.msrb.mxu2 %v1045_v0 }
 0x306   : > { %v879_v2 = vsub.f32 1.5, %v878_v61  ;;  %1076 = vmatpush.xpose.msrb.mxu1 %v1026_v12  ;;  %1150 = vmatpush.msra.mxu3 %v1026_v12 }
 0x307   : > { %v1404_v52 = vpop.eup %1403  ;;  %v709_v8 = vsub.f32 1.5, %v708_v31 }
 0x308   : > { %v866_v59 = vmul.f32 %v1404_v52, %v2277_v7  ;;  %v880_v13 = vmul.f32 %v2275_v48, %v879_v2  ;;  %vm872_vm2 = vweird.f32 %v1404_v52 }
 0x309   : > { %1094 = vmatpush.xpose.msrb.mxu2 %v1044_v55  ;;  %v710_v53 = vmul.f32 %v1402_v41, %v709_v8  ;;  %vm873_vm3 = vmor %vm871_vm11, %vm872_vm2  ;;  %v256_v8 = vld [vmem:[%s2356_s5] sm:$0xff] }
 0x30a   : > { %v867_v17 = vmul.f32 %v1404_v52, %v866_v59  ;;  %v884_v37 = vsel %vm883_vm0, %v2275_v48, %v880_v13 }
 0x30b   : > { %v714_v50 = vsel %vm713_vm14, %v1402_v41, %v710_v53  ;;  %v1042_v1 = vmul.f32 %v884_v37, %v2479_v60 }
 0x30c   : > { %v868_v16 = vmul.f32 0.5, %v867_v17  ;;  %v1025_v47 = vmul.f32 %v714_v50, %v2478_v27 }
 0x30d   : > { %1095 = vmatpush.xpose.msrb.mxu2 %v1043_v33 }
 0x30e   : > { %v869_v46 = vsub.f32 1.5, %v868_v16  ;;  %1077 = vmatpush.xpose.msrb.mxu1 %v1025_v47  ;;  %1151 = vmatpush.msra.mxu3 %v1025_v47 }
 0x310   : > { %1156 = vmatpush.msrb.mxu3 %v1958_v5  ;;  %v870_v34 = vmul.f32 %v1404_v52, %v869_v46 }
 0x311   : > { %1078 = vmatmul.f32.vlgmr.msrb.gmra.mxu1 %v254_v11  ;;  %1096 = vmatpush.xpose.msrb.mxu2 %v1042_v1 }
 0x312   : > { %1157 = vmatpush.msrb.mxu3 %v2011_v39  ;;  %v874_v54 = vsel %vm873_vm3, %v1404_v52, %v870_v34 }
 0x313   : > { %v1041_v44 = vmul.f32 %v874_v54, %v2480_v30 }
 0x314   : > { %1158 = vmatpush.msrb.mxu3 %v2051_v19 }
 0x315   : > { %1097 = vmatpush.xpose.msrb.mxu2 %v1041_v44 }
 0x316   : > { %1159 = vmatpush.msrb.mxu3 %v2077_v35 }
 0x318   : > { %1160 = vmatpush.msrb.mxu3 %v2110_v62  ;;  %1098 = vmatmul.f32.vlgmr.msrb.gmra.mxu2 %v254_v11 }
 0x31a   : > { %1161 = vmatpush.msrb.mxu3 %v2136_v38 }
 0x31c   : > { %1162 = vmatpush.msrb.mxu3 %v2165_v26 }
 0x31e   : > { %1163 = vmatpush.msrb.mxu3 %v2190_v18 }
 0x320   : > { %1164 = vmatpush.msrb.mxu3 %v2207_v10 }
 0x322   : > { %1165 = vmatpush.msrb.mxu3 %v2259_v6 }
 0x324   : > { %1166 = vmatpush.msrb.mxu3 %v2280_v25 }
 0x326   : > { %1167 = vmatpush.msrb.mxu3 %v1045_v0 }
 0x328   : > { %1168 = vmatpush.msrb.mxu3 %v1044_v55 }
 0x32a   : > { %1169 = vmatpush.msrb.mxu3 %v1043_v33 }
 0x32c   : > { %1170 = vmatpush.msrb.mxu3 %v1042_v1 }
 0x32e   : > { %1171 = vmatpush.msrb.mxu3 %v1041_v44 }
 0x363   : > { %v1060_v5 = vpop.permute.xlu1 %1059 }
 0x38e   : > { %v1079_v39 = vpop.f32.mrf.mxu1 }
 0x38f   : > { %v1080_v19 = vadd.f32 %v1079_v39, %v1060_v5 }
 0x391   : > { %v1102_v35 = vrot.slane %v1080_v19, 4 }
 0x393   : > { %v1103_v62 = vmax.f32 %v1080_v19, %v1102_v35 }
 0x395   : > { %v1104_v38 = vrot.slane %v1103_v62, 2 }
 0x397   : > { %v1105_v26 = vmax.f32 %v1103_v62, %v1104_v38 }
 0x399   : > { %v1106_v36 = vrot.slane %v1105_v26, 1 }
 0x39b   : > { %v1107_v18 = vmax.f32 %v1105_v26, %v1106_v36  ;;  %v1099_v20 = vpop.f32.mrf.mxu2 }
 0x39c   : > { %v1100_v15 = vadd.f32 %v1099_v20, %v1060_v5 }
 0x39d   : > { %v1114_v10 = vsub.f32 %v1080_v19, %v1107_v18 }
 0x39e   : > { %v1108_v32 = vrot.slane %v1100_v15, 4 }
 0x39f   : > { %v1116_v6 = vmul.f32 1.442695, %v1114_v10 }
 0x3a0   : > { %v1109_v22 = vmax.f32 %v1100_v15, %v1108_v32 }
 0x3a1   : > { %1405 = vpow2.f32 %v1116_v6 }
 0x3a2   : > { %v1110_v48 = vrot.slane %v1109_v22, 2 }
 0x3a4   : > { %v1111_v28 = vmax.f32 %v1109_v22, %v1110_v48 }
 0x3a6   : > { %v1112_v3 = vrot.slane %v1111_v28, 1 }
 0x3a7   : > { %v1406_v7 = vpop.eup %1405 }
 0x3a8   : > { %v1120_v25 = vrot.slane %v1406_v7, 4  ;;  %v1113_v49 = vmax.f32 %v1111_v28, %v1112_v3 }
 0x3aa   : > { %v1121_v41 = vadd.f32 %v1406_v7, %v1120_v25  ;;  %v1115_v43 = vsub.f32 %v1100_v15, %v1113_v49 }
 0x3ac   : > { %v1122_v58 = vrot.slane %v1121_v41, 2  ;;  %v1118_v14 = vmul.f32 1.442695, %v1115_v43 }
 0x3ae   : > { %v1123_v63 = vadd.f32 %v1122_v58, %v1121_v41  ;;  %1407 = vpow2.f32 %v1118_v14 }
 0x3b0   : > { %v1124_v51 = vrot.slane %v1123_v63, 1 }
 0x3b2   : > { %v1125_v24 = vadd.f32 %v1124_v51, %v1123_v63 }
 0x3b4   : > { %1409 = vrcp.f32 %v1125_v24  ;;  %v1408_v57 = vpop.eup %1407 }
 0x3b5   : > { %v1126_v42 = vrot.slane %v1408_v57, 4 }
 0x3b7   : > { %v1127_v40 = vadd.f32 %v1408_v57, %v1126_v42 }
 0x3b9   : > { %v1128_v0 = vrot.slane %v1127_v40, 2 }
 0x3ba   : > { %v1410_v45 = vpop.eup %1409 }
 0x3bb   : > { %v1134_v21 = vmul.f32 %v1410_v45, %v1406_v7  ;;  %v1129_v61 = vadd.f32 %v1128_v0, %v1127_v40 }
 0x3bd   : > { %1152 = vmatmul.f32.vlgmr.msra.gmra.mxu3 %v1134_v21  ;;  %v1130_v23 = vrot.slane %v1129_v61, 1 }
 0x3bf   : > { %v1131_v12 = vadd.f32 %v1130_v23, %v1129_v61 }
 0x3c1   : > { %1411 = vrcp.f32 %v1131_v12 }
 0x3c7   : > { %v1412_v4 = vpop.eup %1411 }
 0x3c8   : > { %v1135_v31 = vmul.f32 %v1412_v4, %v1408_v57 }
 0x3ca   : > { %1172 = vmatmul.f32.vlgmr.msrb.gmra.mxu3 %v1135_v31  ;;  %v1176_v2 = vadd.f32 %v1135_v31, %v1134_v21 }
 0x3cc   : > { %1177 = vadd.xlane.f32.xlu2 %v1176_v2 }
 0x43f   : > { %v1178_v9 = vpop.xlane.xlu2 %1177 }
 0x440   : > { %v1153_v52 = vpop.f32.mrf.mxu3  ;;  %v1179_v59 = vmul.f32 %v1178_v9, %v256_v8 }
 0x44d   : > { %v1173_v55 = vpop.f32.mrf.mxu3 }
 0x44e   : > { %v1174_v29 = vadd.f32 %v1173_v55, %v1153_v52 }
 0x450   : > { %v1180_v53 = vsub.f32 %v1174_v29, %v1179_v59 }
 0x452   : > { %v1181_v13 = vmul.f32 %v1180_v53, %v1180_v53 }
 0x454   : > { %1182 = vadd.xlane.f32.xlu0 %v1181_v13 }
 0x4c7   : > { %v1183_v17 = vpop.xlane.xlu0 %1182 }
 0x4c8   : > { %v1184_v50 = vmax.f32 %v1183_v17, 1e-24 }
 0x4ca   : > { %1413 = vrsqrt.f32 %v1184_v50  ;;  %vm1191_vm12 = vweird.f32 %v1184_v50 }
 0x4d0   : > { %v1414_v56 = vpop.eup %1413 }
 0x4d1   : > { %v1186_v33 = vmul.f32 %v1414_v56, %v1184_v50  ;;  %vm1192_vm4 = vweird.f32 %v1414_v56 }
 0x4d2   : > { %vm1193_vm5 = vmor %vm1191_vm12, %vm1192_vm4 }
 0x4d3   : > { %v1187_v16 = vmul.f32 %v1414_v56, %v1186_v33 }
 0x4d5   : > { %v1188_v27 = vmul.f32 0.5, %v1187_v16 }
 0x4d7   : > { %v1189_v47 = vsub.f32 1.5, %v1188_v27 }
 0x4d9   : > { %v1190_v37 = vmul.f32 %v1414_v56, %v1189_v47 }
 0x4db   : > { %v1194_v46 = vsel %vm1193_vm5, %v1414_v56, %v1190_v37 }
 0x4dc   : > { %v1196_v11 = vmul.f32 %v1194_v46, %v1194_v46  ;;  %v1195_v15 = vmul.f32 %v1194_v46, %v1180_v53 }
 0x4de   : > { %v1197_v60 = vmul.f32 %v1196_v11, %v1183_v17 }
 0x4e0   : > { %v1199_v1 = vsel %vm1198_vm6, %v1197_v60, 0.0 }
 0x4e1   : > { %1200 = vadd.xlane.f32.xlu2 %v1199_v1 }
 0x554   : > { %v1201_v34 = vpop.xlane.xlu2 %1200 }
 0x555   : > { %v1202_v54 = vrot.slane %v1201_v34, 4 }
 0x557   : > { %v1203_v30 = vadd.f32 %v1202_v54, %v1201_v34 }
 0x559   : > { %v1204_v44 = vrot.slane %v1203_v30, 2 }
 0x55b   : > { %v1205_v5 = vadd.f32 %v1204_v44, %v1203_v30 }
 0x55d   : > { %v1206_v39 = vrot.slane %v1205_v5, 1 }
 0x55f   : > { %v1207_v19 = vadd.f32 %v1206_v39, %v1205_v5 }
 0x561   : > { %1323 = vpush %v1207_v19 }
 0x592   : > { %s1324_s14 = spop %1323 }
 0x593   : > { %s1209_s16 = smax.f32 %s1426_s15, %s1324_s14 }
 0x594   : > { %v1210_v35 = vstv %s1209_s16 }
 0x595   : > { %1415 = vrsqrt.f32 %v1210_v35  ;;  %vm1217_vm7 = vweird.f32 %v1210_v35 }
 0x59b   : > { %v1416_v62 = vpop.eup %1415 }
 0x59c   : > { %v1212_v38 = vmul.f32 %v1416_v62, %v1210_v35  ;;  %vm1218_vm1 = vweird.f32 %v1416_v62 }
 0x59d   : > { %vm1219_vm8 = vmor %vm1217_vm7, %vm1218_vm1 }
 0x59e   : > { %v1213_v26 = vmul.f32 %v1416_v62, %v1212_v38 }
 0x5a0   : > { %v1214_v36 = vmul.f32 0.5, %v1213_v26 }
 0x5a2   : > { %v1215_v18 = vsub.f32 1.5, %v1214_v36 }
 0x5a4   : > { %v1216_v20 = vmul.f32 %v1416_v62, %v1215_v18 }
 0x5a6   : > { %v1220_v10 = vsel %vm1219_vm8, %v1416_v62, %v1216_v20 }
 0x5a7   : > { %1325 = vpush %v1220_v10 }
 0x5d8   : > { %s1326_s18 = spop %1325 }
 0x5d9   : > { %v1222_v6 = vstv %s1326_s18 }
 0x5da   : > { %v1223_v32 = vmul.f32 %v1222_v6, %v1195_v15 }
 0x5dc   : > { %1224 = vst [vmem:[%s251_s23] sm:$0xff] %v1223_v32 }
 0x5dd PF: > { %s16_s21 = sadd.s32 1, %s1423_s21  }
 0x5de   : > { %p13_p5 = scmp.ge.s32.totalorder %s16_s21, 4  }
 0x5e0   :  { %15 = sbr.rel (!%p13_p5) target bundleno = 1 (0x1), region = 74 }

</bundles_post_ra>
